<compile_context>
chip_gen: v7x
topology: tpu7x:2x2x1
jax: 0.10.0
libtpu: 0.0.40
codegen_flags: <defaults>
</compile_context>

<pallas_src>
import math

import jax
import jax.numpy as jnp
from jax.experimental import pallas as pl
from jax.experimental.pallas import tpu as pltpu


# ---------------------------------------------------------------------------
# Pallas kernel
# ---------------------------------------------------------------------------
def _a_region_kernel(xm_ref, xn_ref, w1_ref, b1_ref, w2_ref, b2_ref, adj_ref):
    xm = xm_ref[...]                       # (B, TM, D)  m-rows of this block
    xn = xn_ref[...]                       # (B, N,  D)  all n columns
    B, TM, D = xm.shape
    N = xn.shape[1]

    # W_new[b, m, n, :] = x[b, n, :] - x[b, m, :]  (pair-difference grid, f32 VPU)
    diff = xn[:, None, :, :] - xm[:, :, None, :]            # (B, TM, N, D)

    # conv2d_1 (1x1, D->D) == channels-last matmul: bf16 on the MXU, f32 acc.
    lhs = diff.reshape(B * TM * N, D)
    h = jnp.dot(lhs.astype(jnp.bfloat16),
                w1_ref[...].astype(jnp.bfloat16),
                preferred_element_type=jnp.float32) + b1_ref[...]
    h = jnp.maximum(h, 0.0)                                 # ReLU in f32

    # conv2d_2 (1x1, D->1) == per-pair dot with a vector -> lane reduce.
    h = h.reshape(B * TM, N, D)
    logits = jnp.sum(h * w2_ref[...].reshape(1, 1, D), axis=-1) + b2_ref[...]

    # F.softmax(W_new, dim=2): softmax over the n axis, f32.
    mx = jnp.max(logits, axis=-1, keepdims=True)
    e = jnp.exp(logits - mx)
    p = e / jnp.sum(e, axis=-1, keepdims=True)
    adj_ref[...] = p.reshape(B, TM, N)


def _choose_tm(B, N, D, budget_bytes=8 << 20):
    """Pick an m-row tile so the (B, TM, N, D) diff block stays well inside VMEM."""
    if N <= 8:
        return N
    bytes_per_m_row = B * N * max(D, 8) * 4 * 4   # diff + activations + slack
    tm = budget_bytes // max(bytes_per_m_row, 1)
    if tm >= N:
        return N
    return max(8, (tm // 8) * 8)


def a_region_compute(cat_feature, params, *, tm=None):
    """Pallas TPU implementation of A_region_compute.forward.

    cat_feature: (B, N, D) float32
    params: w1 (D, D) = conv2d_1 weight transposed to (C_in, C_out),
            b1 (1, D), w2 (1, D) = conv2d_2 weight, b2 (1, 1).
    Returns Adj_M of shape (B, N, N).
    """
    B, N, D = cat_feature.shape
    w1, b1, w2, b2 = params["w1"], params["b1"], params["w2"], params["b2"]

    if tm is None:
        tm = _choose_tm(B, N, D)
    tm = min(tm, N)
    if tm != N:
        tm = max(8, (tm // 8) * 8)       # (8, 128) sublane constraint

    grid = (pl.cdiv(N, tm),)

    in_specs = [
        pl.BlockSpec((B, tm, D), lambda i: (0, i, 0)),   # m-row block of x
        pl.BlockSpec((B, N, D), lambda i: (0, 0, 0)),    # full x (n columns)
        pl.BlockSpec(w1.shape, lambda i: (0, 0)),
        pl.BlockSpec(b1.shape, lambda i: (0, 0)),
        pl.BlockSpec(w2.shape, lambda i: (0, 0)),
        pl.BlockSpec(b2.shape, lambda i: (0, 0)),
    ]
    out_specs = pl.BlockSpec((B, tm, N), lambda i: (0, i, 0))

    return pl.pallas_call(
        _a_region_kernel,
        out_shape=jax.ShapeDtypeStruct((B, N, N), jnp.float32),
        grid_spec=pltpu.PrefetchScalarGridSpec(
            num_scalar_prefetch=0, grid=grid,
            in_specs=in_specs, out_specs=out_specs),
        compiler_params=pltpu.CompilerParams(
            dimension_semantics=("parallel",)),
    )(cat_feature, cat_feature, w1, b1, w2, b2)


# ---------------------------------------------------------------------------
# Pure-JAX transliteration of the PyTorch module (reference for checking)
# ---------------------------------------------------------------------------
def a_region_reference(cat_feature, conv1_w, conv1_b, conv2_w, conv2_b):
    W1 = cat_feature[:, :, None, :]                 # unsqueeze(2)   (B, N, 1, D)
    W2 = jnp.transpose(W1, (0, 2, 1, 3))            # transpose(1,2) (B, 1, N, D)
    W_new = W1 - W2                                 # (B, N, N, D)
    W_new = jnp.transpose(W_new, (0, 3, 2, 1))      # transpose(1,3) (B, D, N, N)
    h = jnp.einsum('od,bdij->boij', conv1_w, W_new) + conv1_b[None, :, None, None]
    h = jnp.maximum(h, 0.0)
    logit = jnp.einsum('od,bdij->boij', conv2_w, h) + conv2_b[None, :, None, None]
    logit = logit[:, 0]                             # squeeze(1) -> (B, N, N)
    return jax.nn.softmax(logit, axis=2)


# ---------------------------------------------------------------------------
if __name__ == "__main__":
    key = jax.random.PRNGKey(0)
    B, N, D = 2, 32, 5        # batch, ROIs per image, input_features (HKRM uses 5)
    k_w1, k_b1, k_w2, k_b2, k_x = jax.random.split(key, 5)

    # Conv weights in PyTorch layout (C_out, C_in) for the two 1x1 convs.
    conv1_w = jax.random.normal(k_w1, (D, D), jnp.float32) / math.sqrt(D)
    conv1_b = jax.random.normal(k_b1, (D,), jnp.float32) * 0.01
    conv2_w = jax.random.normal(k_w2, (1, D), jnp.float32) / math.sqrt(D)
    conv2_b = jax.random.normal(k_b2, (1,), jnp.float32) * 0.01

    # cat_feature ~ [normalized box coords, objectness score] as in HKRM.
    cat_feature = jax.random.uniform(k_x, (B, N, D), jnp.float32, 0.0, 1.0)

    params = {
        "w1": conv1_w.T,                 # (C_in, C_out) so y = x @ w1
        "b1": conv1_b.reshape(1, D),
        "w2": conv2_w,                   # (1, D) vector for the D -> 1 conv
        "b2": conv2_b.reshape(1, 1),
    }

    # tm=8 exercises the m-row tiling path (grid=(4,)).
    adj = a_region_compute(cat_feature, params, tm=8)
    adj = jax.block_until_ready(adj)

    ref = a_region_reference(cat_feature, conv1_w, conv1_b, conv2_w, conv2_b)
    max_err = float(jnp.max(jnp.abs(adj - ref)))
    row_err = float(jnp.max(jnp.abs(jnp.sum(adj, axis=-1) - 1.0)))
    assert adj.shape == (B, N, N), adj.shape
    assert max_err < 2e-2, f"max |kernel - reference| = {max_err}"
    assert row_err < 1e-3, f"softmax rows not normalized: {row_err}"
    print("KERNEL_OK")
</pallas_src>

<mosaic_0001>
module attributes {stable_mosaic.version = 11 : i64} {
  func.func @_a_region_kernel(%arg0: i32, %arg1: memref<2x8x5xf32, #tpu.memory_space<vmem>>, %arg2: memref<2x32x5xf32, #tpu.memory_space<vmem>>, %arg3: memref<5x5xf32, #tpu.memory_space<vmem>>, %arg4: memref<1x5xf32, #tpu.memory_space<vmem>>, %arg5: memref<1x5xf32, #tpu.memory_space<vmem>>, %arg6: memref<1x1xf32, #tpu.memory_space<vmem>>, %arg7: memref<2x8x32xf32, #tpu.memory_space<vmem>>) attributes {dimension_semantics = [#tpu.dimension_semantics<parallel>], iteration_bounds = array<i64: 4>, scalar_prefetch = 0 : i64, scratch_operands = 0 : i64, tpu.core_type = #tpu.core_type<tc>, window_params = [{transform_indices = @transform_0, window_bounds = array<i64: 2, 8, 5>}, {pipeline_mode = #tpu.pipeline_mode<synchronous>, transform_indices = @transform_1, window_bounds = array<i64: 2, 32, 5>}, {pipeline_mode = #tpu.pipeline_mode<synchronous>, transform_indices = @transform_2, window_bounds = array<i64: 5, 5>}, {pipeline_mode = #tpu.pipeline_mode<synchronous>, transform_indices = @transform_3, window_bounds = array<i64: 1, 5>}, {pipeline_mode = #tpu.pipeline_mode<synchronous>, transform_indices = @transform_4, window_bounds = array<i64: 1, 5>}, {pipeline_mode = #tpu.pipeline_mode<synchronous>, transform_indices = @transform_5, window_bounds = array<i64: 1, 1>}, {transform_indices = @transform_6, window_bounds = array<i64: 2, 8, 32>}]} {
    %c0 = arith.constant 0 : index
    %c0_0 = arith.constant 0 : index
    %c0_1 = arith.constant 0 : index
    %0 = vector.load %arg1[%c0, %c0_0, %c0_1] : memref<2x8x5xf32, #tpu.memory_space<vmem>>, vector<2x8x5xf32>
    %c0_2 = arith.constant 0 : index
    %c0_3 = arith.constant 0 : index
    %c0_4 = arith.constant 0 : index
    %1 = vector.load %arg2[%c0_2, %c0_3, %c0_4] : memref<2x32x5xf32, #tpu.memory_space<vmem>>, vector<2x32x5xf32>
    %2 = vector.shape_cast %1 : vector<2x32x5xf32> to vector<2x1x32x5xf32>
    %3 = vector.shape_cast %0 : vector<2x8x5xf32> to vector<2x8x1x5xf32>
    %4 = vector.broadcast %2 : vector<2x1x32x5xf32> to vector<2x8x32x5xf32>
    %5 = vector.broadcast %3 : vector<2x8x1x5xf32> to vector<2x8x32x5xf32>
    %6 = arith.subf %4, %5 : vector<2x8x32x5xf32>
    %7 = vector.shape_cast %6 : vector<2x8x32x5xf32> to vector<512x5xf32>
    %8 = arith.truncf %7 : vector<512x5xf32> to vector<512x5xbf16>
    %c0_5 = arith.constant 0 : index
    %c0_6 = arith.constant 0 : index
    %9 = vector.load %arg3[%c0_5, %c0_6] : memref<5x5xf32, #tpu.memory_space<vmem>>, vector<5x5xf32>
    %10 = arith.truncf %9 : vector<5x5xf32> to vector<5x5xbf16>
    %cst = arith.constant dense<0.000000e+00> : vector<512x5xf32>
    %11 = tpu.matmul %8, %10, %cst {dimension_numbers = #tpu.dot_dimension_numbers<[1], [0], [0], [1], [0, 0, 1, 1], [], []>} : vector<512x5xbf16>, vector<5x5xbf16>, vector<512x5xf32> -> vector<512x5xf32>
    %c0_7 = arith.constant 0 : index
    %c0_8 = arith.constant 0 : index
    %12 = vector.load %arg4[%c0_7, %c0_8] : memref<1x5xf32, #tpu.memory_space<vmem>>, vector<1x5xf32>
    %13 = vector.broadcast %12 : vector<1x5xf32> to vector<512x5xf32>
    %14 = arith.addf %11, %13 : vector<512x5xf32>
    %cst_9 = arith.constant 0.000000e+00 : f32
    %15 = vector.broadcast %cst_9 : f32 to vector<512x5xf32>
    %16 = arith.maximumf %14, %15 : vector<512x5xf32>
    %17 = vector.shape_cast %16 : vector<512x5xf32> to vector<16x32x5xf32>
    %c0_10 = arith.constant 0 : index
    %c0_11 = arith.constant 0 : index
    %18 = vector.load %arg5[%c0_10, %c0_11] : memref<1x5xf32, #tpu.memory_space<vmem>>, vector<1x5xf32>
    %19 = vector.shape_cast %18 : vector<1x5xf32> to vector<1x1x5xf32>
    %20 = vector.broadcast %19 : vector<1x1x5xf32> to vector<16x32x5xf32>
    %21 = arith.mulf %17, %20 : vector<16x32x5xf32>
    %cst_12 = arith.constant dense<0.000000e+00> : vector<16x32xf32>
    %22 = vector.multi_reduction <add>, %21, %cst_12 [2] : vector<16x32x5xf32> to vector<16x32xf32>
    %c0_13 = arith.constant 0 : index
    %c0_14 = arith.constant 0 : index
    %23 = vector.load %arg6[%c0_13, %c0_14] : memref<1x1xf32, #tpu.memory_space<vmem>>, vector<1x1xf32>
    %24 = vector.broadcast %23 : vector<1x1xf32> to vector<16x32xf32>
    %25 = arith.addf %22, %24 : vector<16x32xf32>
    %cst_15 = arith.constant dense<0xFF800000> : vector<16xf32>
    %26 = vector.multi_reduction <maximumf>, %25, %cst_15 [1] : vector<16x32xf32> to vector<16xf32>
    %27 = vector.shape_cast %26 : vector<16xf32> to vector<16x1xf32>
    %28 = vector.broadcast %27 : vector<16x1xf32> to vector<16x32xf32>
    %29 = arith.subf %25, %28 : vector<16x32xf32>
    %30 = math.exp %29 : vector<16x32xf32>
    %cst_16 = arith.constant dense<0.000000e+00> : vector<16xf32>
    %31 = vector.multi_reduction <add>, %30, %cst_16 [1] : vector<16x32xf32> to vector<16xf32>
    %32 = vector.shape_cast %31 : vector<16xf32> to vector<16x1xf32>
    %33 = vector.broadcast %32 : vector<16x1xf32> to vector<16x32xf32>
    %34 = arith.divf %30, %33 : vector<16x32xf32>
    %35 = vector.shape_cast %34 : vector<16x32xf32> to vector<2x8x32xf32>
    %c0_17 = arith.constant 0 : index
    %c0_18 = arith.constant 0 : index
    %c0_19 = arith.constant 0 : index
    %36 = vector.load %arg7[%c0_17, %c0_18, %c0_19] : memref<2x8x32xf32, #tpu.memory_space<vmem>>, vector<2x8x32xf32>
    tpu.vector_store %arg7[%c0_17, %c0_18, %c0_19], %35 {strides = array<i32>} : memref<2x8x32xf32, #tpu.memory_space<vmem>>, vector<2x8x32xf32>,
    return
  }
  func.func @transform_0(%arg0: i32) -> (i32, i32, i32) {
    %c0_i32 = arith.constant 0 : i32
    %c0_i32_0 = arith.constant 0 : i32
    %c0_i32_1 = arith.constant 0 : i32
    return %c0_i32, %arg0, %c0_i32_0 : i32, i32, i32
  }
  func.func @transform_1(%arg0: i32) -> (i32, i32, i32) {
    %c0_i32 = arith.constant 0 : i32
    %c0_i32_0 = arith.constant 0 : i32
    %c0_i32_1 = arith.constant 0 : i32
    %c0_i32_2 = arith.constant 0 : i32
    return %c0_i32, %c0_i32_0, %c0_i32_1 : i32, i32, i32
  }
  func.func @transform_2(%arg0: i32) -> (i32, i32) {
    %c0_i32 = arith.constant 0 : i32
    %c0_i32_0 = arith.constant 0 : i32
    %c0_i32_1 = arith.constant 0 : i32
    return %c0_i32, %c0_i32_0 : i32, i32
  }
  func.func @transform_3(%arg0: i32) -> (i32, i32) {
    %c0_i32 = arith.constant 0 : i32
    %c0_i32_0 = arith.constant 0 : i32
    %c0_i32_1 = arith.constant 0 : i32
    return %c0_i32, %c0_i32_0 : i32, i32
  }
  func.func @transform_4(%arg0: i32) -> (i32, i32) {
    %c0_i32 = arith.constant 0 : i32
    %c0_i32_0 = arith.constant 0 : i32
    %c0_i32_1 = arith.constant 0 : i32
    return %c0_i32, %c0_i32_0 : i32, i32
  }
  func.func @transform_5(%arg0: i32) -> (i32, i32) {
    %c0_i32 = arith.constant 0 : i32
    %c0_i32_0 = arith.constant 0 : i32
    %c0_i32_1 = arith.constant 0 : i32
    return %c0_i32, %c0_i32_0 : i32, i32
  }
  func.func @transform_6(%arg0: i32) -> (i32, i32, i32) {
    %c0_i32 = arith.constant 0 : i32
    %c0_i32_0 = arith.constant 0 : i32
    %c0_i32_1 = arith.constant 0 : i32
    return %c0_i32, %arg0, %c0_i32_0 : i32, i32, i32
  }
}

</mosaic_0001>

<bundles_post_ra>
// kernel: tpu_custom_call.1
= control target key start
LH: loop header
LB: loop body
LE: loop exit
PB: predicated region body
PF: predicated region fallthrough
CT: control target
= control target key end

     0   :  { %s5901_s0 = inlined_call_operand.vmem [shape: f32[2,32,5], index: 0, kind: input, shape index: {}]   ;;  %s5902_s1 = inlined_call_operand.vmem [shape: f32[2,32,5], index: 1, kind: input, shape index: {}]   ;;  %s5903_s2 = inlined_call_operand.vmem [shape: f32[5,5], index: 2, kind: input, shape index: {}]   ;;  %s5904_s3 = inlined_call_operand.vmem [shape: f32[1,5], index: 3, kind: input, shape index: {}]   ;;  %s5905_s4 = inlined_call_operand.vmem [shape: f32[1,5], index: 4, kind: input, shape index: {}]   ;;  %s5906_s5 = inlined_call_operand.<no memory space> [shape: f32[1,1], index: 5, kind: input, shape index: {}]   ;;  %s5907_s6 = inlined_call_operand.hbm [shape: f32[2,32,32], index: 6, kind: output, shape index: {}]  }
   0x1   :  { %v11_v0 = vstv %s5906_s5 }
   0x2   :  { %12 = vst [vmem:[#allocation2] sm:$0x1] %v11_v0 }
   0x3   :  { %13 = vsyncpa [#allocation5], 0 }
   0x4   :  { %15 = vsyncpa [#allocation5 + $0x1], 0  ;;  %s3929_s23 = smov 0   ;;  %s3931_s24 = smov 0  }
   0x5   :  { %s3933_s25 = smov 0   ;;  %s3935_s26 = smov 0  }
   0x6 LB: > { %s3462_s5 = sadd.s32 4294967295, %s3882_s26   ;;  %s3463_s27 = sadd.s32 4294967294, %s3882_s26   ;;  %s3882_s26 = sphi %s3935_s26, %s6183_s26   ;;  %s3878_s25 = sphi %s3933_s25, %s6182_s25   ;;  %s3874_s24 = sphi %s3931_s24, %s6181_s24   ;;  %s3870_s23 = sphi %s3929_s23, %s6180_s23  }
   0x7   : > { %s3952_s28 = sadd.s32 1, %s3882_s26   ;;  %s28_s29 = sadd.s32 1, %s3878_s25 }
   0x8   : > { %s25_s30 = ssub.s32 %s3882_s26, %s3952_s28  ;;  %p35_p0 = scmp.ne.s32.totalorder %s3878_s25, %s3874_s24 }
   0x9   : > { %p26_p1 = scmp.eq.s32.totalorder %s25_s30, 0  ;;  %p36_p2 = scmp.eq.s32.totalorder %s3882_s26, 0 }
   0xa   : > { %p170_p3 = scmp.eq.s32.totalorder %s3462_s5, 3  ;;  %p175_p4 = scmp.ne.s32.totalorder %s3874_s24, %s3870_s23 }
   0xb   : > { %s3965_s7 = scalar_select %p26_p1, %s3878_s25, %s28_s29  }
   0xc   : > { %p37_p5 = por %p36_p2, %p35_p0  ;;  %p3967_p6 = por %p170_p3, %p35_p0 }
   0xd   : > { %p176_p7 = scmp.eq.s32.totalorder %s3463_s27, 3  ;;  %p3465_p9 = scmp.ge.s32.totalorder %s3882_s26, 4 }
   0xf   : > { %p3971_p8 = por %p176_p7, %p175_p4  ;;  %207 = sbr.rel (%p3465_p9) target bundleno = 29 (0x1d), region = 36 }
  0x16   : > { %210 = sbr.rel (!%p37_p5) target bundleno = 29 (0x1d), region = 40  ;;  %s212_s10 = sand.u32 (%p37_p5), 1, %s3878_s25  }
  0x17   : > { %s3467_s11 = sshll.u32 (%p37_p5), %s3882_s26, 3  ;;  %s3466_s12 = sshll.u32 (%p37_p5), %s212_s10, 4 }
  0x18   : > { %s216_s15 = scalar_lea.vmem (%p37_p5), %s5901_s0, %s3467_s11  ;;  %s214_s16 = scalar_lea.vmem (%p37_p5), [#allocation3], %s3466_s12 }
  0x19   : > { %v246_v1 = vld [vmem:[%s216_s15] sm:$0xff] (%p37_p5) }
  0x1a   : > { %v248_v2 = vld [vmem:[%s216_s15 + $0x20] sm:$0xff] (%p37_p5)  ;;  %247 = vst [vmem:[%s214_s16] sm:$0xff] (%p37_p5), %v246_v1 }
  0x1b   : > { %249 = vst [vmem:[%s214_s16 + $0x8] sm:$0xff] (%p37_p5), %v248_v2 }
  0x1d PF: > { %p3468_p10 = scmp.ge.s32.totalorder %s3882_s26, 1  ;;  %p254_p11 = scmp.lt.s32.totalorder %s3882_s26, 5 }
  0x1f   : > { %p255_p12 = pnand %p3468_p10, %p254_p11 }
  0x21   : > { %258 = sbr.rel (%p255_p12) target bundleno = 1385 (0x569), region = 78 }
  0x28   : > { %v577_v3 = vld [vmem:[%s5903_s2] sm:$0x1f]  ;;  %vm683_vm0 = vcmask 1041408   ;;  %vm684_vm1 = vcmask 1042432   ;;  %s261_s19 = sand.u32 1, %s3874_s24   ;;  %v307_v4 = vlaneseq  ;;  %v3884_v6 = vmov 65535  }
  0x29   : > { %v578_v5 = vpack.c.bf16 %v577_v3, %v577_v3  ;;  %v685_v7 = vsel %vm683_vm0, 4294967295, %v3884_v6  ;;  %s3989_s20 = sshll.u32 %s261_s19, 4  ;;  %v3885_v9 = vmov 1966171168   ;;  %v4006_v20 = vld [vmem:[%s5902_s1] sm:$0xff]  ;;  %v4011_v21 = vld [vmem:[%s5902_s1 + $0x8] sm:$0xff] }
  0x2a   : > { %v686_v8 = vsel %vm684_vm1, %v685_v7, 0  ;;  %v305_v10 = vunpack.c.l.s4 %v3885_v9  ;;  %v3992_v11 = vshrl.u32 %v307_v4, 7  ;;  %s263_s21 = scalar_lea.vmem [#allocation3], %s3989_s20  ;;  %vm586_vm2 = vcmask 39936   ;;  %v4018_v26 = vld [vmem:[%s5902_s1 + $0x20] sm:$0xff]  ;;  %v4023_v27 = vld [vmem:[%s5902_s1 + $0x28] sm:$0xff] }
  0x2b   : > { %v688_v12 = vand.u32 %v686_v8, %v578_v5  ;;  %v291_v14 = vld [vmem:[%s263_s21] sm:$0xff]  ;;  %v292_v15 = vld [vmem:[%s263_s21 + $0x8] sm:$0xff]  ;;  %vm1455_vm3 = vcmask 130112   ;;  %vm1462_vm4 = vcmask 195712   ;;  %vm1469_vm5 = vcmask 261312   ;;  %s5779_s12 = scalar_lea.vmem [#allocation4], %s3989_s20 }
  0x2c   : > { %5994 = vst [vmem:[#allocation7_spill] sm:$0xff] %v3992_v11  ;;  %v306_v13 = vunpack.c.0.s8 %v305_v10  ;;  %v4000_v18 = vsub.s32 0, %v3992_v11  ;;  %v4028_v28 = vld [vmem:[%s5902_s1 + $0x10] sm:$0xff]  ;;  %v303_v29 = vcombine.high %v291_v14, %v291_v14  ;;  %v352_v31 = vcombine.high %v292_v15, %v292_v15  ;;  %v4035_v33 = vld [vmem:[%s5902_s1 + $0x18] sm:$0xff]  ;;  %s3395_s20 = sshll.u32 %s5779_s12, 4  ;;  %s3507_s13 = sshll.u32 %s3462_s5, 7  ;;  %s5842_s20 = int_to_ptr.vmem [resolvable:$true] %s3395_s20 }
  0x2d   : > { %3543 = vmatprep.subr.bf16.mxu0 %v688_v12  ;;  %3609 = vmatprep.subr.bf16.mxu1 %v688_v12  ;;  %v4040_v34 = vld [vmem:[%s5902_s1 + $0x30] sm:$0xff]  ;;  %v4045_v35 = vld [vmem:[%s5902_s1 + $0x38] sm:$0xff]  ;;  %vm1756_vm6 = vcmask 1041409   ;;  %vm1758_vm7 = vcmask 1042434   ;;  %vm1760_vm8 = vcmask 1043459   ;;  %vm1762_vm9 = vcmask 1044484   ;;  %s5851_s15 = scalar_lea.hbm %s5907_s6, %s3507_s13 }
  0x2e   : > { %3544 = vmatpush3.bf16.msra.mxu0 %v688_v12  ;;  %3610 = vmatpush3.bf16.msra.mxu1 %v688_v12  ;;  %v3996_v16 = vsub.s32 %v306_v13, %v3992_v11  ;;  %5995 = vst [vmem:[#allocation8_spill] sm:$0xff] %v4000_v18  ;;  %vm1764_vm10 = vcmask 1045509   ;;  %vm1766_vm11 = vcmask 1046534   ;;  %vm1768_vm12 = vcmask 1047559   ;;  %s5860_s16 = scalar_lea.sflag [#allocation5], %s261_s19  ;;  %s3820_s17 = scalar_lea.vmem %s5842_s20, 256 }
  0x2f   : > { %vm1779_vm13 = vcmask 261120   ;;  %p3821_p13 = scmp.ne.s32.totalorder %s5842_s20, %s3820_s17  ;;  %s3887_s18 = smov [#allocation4]  }
  0x30   : > { %v310_v17 = vrot.slane %v291_v14, %v3996_v16  ;;  %v359_v19 = vrot.slane %v292_v15, %v3996_v16  ;;  %v317_v2 = vrot.slane %v303_v29, %v3996_v16  ;;  %v366_v6 = vrot.slane %v352_v31, %v3996_v16  ;;  %s3824_s21 = sshll.u32 %s3887_s18, 4  ;;  %s3825_s21 = int_to_ptr.vmem [resolvable:$false] %s3824_s21 }
  0x31   : > { %p3822_p0 = pnand %p3821_p13, %p3967_p6  ;;  %s3826_s22 = scalar_lea.vmem %s3825_s21, 512 }
  0x32   : > { %v318_v22 = vcombine.high %v310_v17, %v310_v17  ;;  %v326_v23 = vrot.slane %v310_v17, %v3996_v16  ;;  %v367_v24 = vcombine.high %v359_v19, %v359_v19  ;;  %v375_v25 = vrot.slane %v359_v19, %v3996_v16  ;;  %p3827_p2 = scmp.lt.s32.totalorder %s5842_s20, %s3825_s21  ;;  %p3828_p3 = scmp.lt.s32.totalorder %s3826_s22, %s3820_s17 }
  0x33   : > { %v333_v19 = vrot.slane %v317_v2, %v3996_v16  ;;  %p3823_p1 = pneg %p3822_p0 }
  0x34   : > { %v404_v30 = vrot.slane %v326_v23, %v4000_v18  ;;  %v436_v32 = vrot.slane %v375_v25, %v4000_v18  ;;  %v348_v36 = vcombine.high %v326_v23, %v326_v23  ;;  %v397_v37 = vcombine.high %v375_v25, %v375_v25  ;;  %p3829_p4 = por %p3828_p3, %p3827_p2 }
  0x35   : > { %v340_v38 = vrot.slane %v318_v22, %v3996_v16  ;;  %v389_v39 = vrot.slane %v367_v24, %v3996_v16  ;;  %v382_v25 = vrot.slane %v366_v6, %v3996_v16 }
  0x36   : > { %v481_v40 = vsub.f32 %v4006_v20, %v404_v30  ;;  %v482_v41 = vsub.f32 %v4011_v21, %v404_v30  ;;  %v513_v42 = vsub.f32 %v4018_v26, %v436_v32  ;;  %v514_v43 = vsub.f32 %v4023_v27, %v436_v32  ;;  %p3830_p5 = pnand %p3829_p4, %p3823_p1 }
  0x37   : > { %v483_v44 = vsub.f32 %v4028_v28, %v404_v30  ;;  %v484_v45 = vsub.f32 %v4035_v33, %v404_v30  ;;  %v515_v46 = vsub.f32 %v4040_v34, %v436_v32  ;;  %v516_v47 = vsub.f32 %v4045_v35, %v436_v32 }
  0x38   : > { %v545_v48 = vpack.c.bf16 %v482_v41, %v481_v40  ;;  %v561_v49 = vpack.c.bf16 %v514_v43, %v513_v42  ;;  %v408_v50 = vrot.slane %v340_v38, %v4000_v18  ;;  %v440_v51 = vrot.slane %v389_v39, %v4000_v18 }
  0x39   : > { %v546_v52 = vpack.c.bf16 %v484_v45, %v483_v44  ;;  %v562_v53 = vpack.c.bf16 %v516_v47, %v515_v46  ;;  %v412_v54 = vrot.slane %v348_v36, %v4000_v18  ;;  %v444_v55 = vrot.slane %v397_v37, %v4000_v18 }
  0x3a   : > { %3545 = vmatprep.mubr.msk.bf16.mxu0 %vm586_vm2, %v545_v48  ;;  %3577 = vmatprep.mubr.msk.bf16.mxu1 %vm586_vm2, %v561_v49  ;;  %v485_v56 = vsub.f32 %v4006_v20, %v408_v50  ;;  %v486_v57 = vsub.f32 %v4011_v21, %v408_v50  ;;  %v487_v58 = vsub.f32 %v4028_v28, %v408_v50 }
  0x3b   : > { %3546 = vmatmul.mubr.msk.bf16.vlgmr.msra.gmra.mrb[0].mxu0 %vm586_vm2, %v546_v52  ;;  %3578 = vmatmul.mubr.msk.bf16.vlgmr.msra.gmra.mrb[0].mxu1 %vm586_vm2, %v562_v53  ;;  %v488_v59 = vsub.f32 %v4035_v33, %v408_v50  ;;  %v517_v60 = vsub.f32 %v4018_v26, %v440_v51  ;;  %v518_v61 = vsub.f32 %v4023_v27, %v440_v51 }
  0x3c   : > { %v547_v62 = vpack.c.bf16 %v486_v57, %v485_v56  ;;  %v519_v63 = vsub.f32 %v4040_v34, %v440_v51  ;;  %v520_v0 = vsub.f32 %v4045_v35, %v440_v51  ;;  %v489_v1 = vsub.f32 %v4006_v20, %v412_v54 }
  0x3d   : > { %v563_v3 = vpack.c.bf16 %v518_v61, %v517_v60  ;;  %v490_v5 = vsub.f32 %v4011_v21, %v412_v54  ;;  %v521_v7 = vsub.f32 %v4018_v26, %v444_v55  ;;  %v522_v8 = vsub.f32 %v4023_v27, %v444_v55 }
  0x3e   : > { %3549 = vmatprep.mubr.msk.bf16.mxu0 %vm586_vm2, %v547_v62  ;;  %v548_v9 = vpack.c.bf16 %v488_v59, %v487_v58  ;;  %v564_v10 = vpack.c.bf16 %v520_v0, %v519_v63  ;;  %v350_v12 = vcombine.high %v340_v38, %v340_v38  ;;  %v399_v15 = vcombine.high %v389_v39, %v389_v39 }
  0x3f   : > { %3581 = vmatprep.mubr.msk.bf16.mxu1 %vm586_vm2, %v563_v3  ;;  %v549_v13 = vpack.c.bf16 %v490_v5, %v489_v1  ;;  %v565_v14 = vpack.c.bf16 %v522_v8, %v521_v7  ;;  %v491_v22 = vsub.f32 %v4028_v28, %v412_v54  ;;  %v492_v23 = vsub.f32 %v4035_v33, %v412_v54 }
  0x40   : > { %v416_v17 = vrot.slane %v350_v12, %v4000_v18  ;;  %v448_v24 = vrot.slane %v399_v15, %v4000_v18  ;;  %v523_v29 = vsub.f32 %v4040_v34, %v444_v55  ;;  %v524_v30 = vsub.f32 %v4045_v35, %v444_v55 }
  0x41   : > { %v420_v38 = vrot.slane %v333_v19, %v4000_v18  ;;  %v550_v39 = vpack.c.bf16 %v492_v23, %v491_v22  ;;  %v319_v41 = vcombine.high %v317_v2, %v317_v2  ;;  %v452_v44 = vrot.slane %v382_v25, %v4000_v18 }
  0x42   : > { %v493_v31 = vsub.f32 %v4006_v20, %v416_v17  ;;  %v494_v32 = vsub.f32 %v4011_v21, %v416_v17  ;;  %v525_v36 = vsub.f32 %v4018_v26, %v448_v24  ;;  %v526_v37 = vsub.f32 %v4023_v27, %v448_v24 }
  0x43   : > { %3550 = vmatmul.mubr.msk.bf16.gmra.mrb[4].mxu0 %vm586_vm2, %v548_v9  ;;  %3582 = vmatmul.mubr.msk.bf16.gmra.mrb[4].mxu1 %vm586_vm2, %v564_v10  ;;  %v566_v40 = vpack.c.bf16 %v524_v30, %v523_v29  ;;  %v368_v45 = vcombine.high %v366_v6, %v366_v6  ;;  %v495_v46 = vsub.f32 %v4028_v28, %v416_v17 }
  0x44   : > { %3553 = vmatprep.mubr.msk.bf16.mxu0 %vm586_vm2, %v549_v13  ;;  %3585 = vmatprep.mubr.msk.bf16.mxu1 %vm586_vm2, %v565_v14  ;;  %v551_v42 = vpack.c.bf16 %v494_v32, %v493_v31  ;;  %v567_v43 = vpack.c.bf16 %v526_v37, %v525_v36  ;;  %v496_v47 = vsub.f32 %v4035_v33, %v416_v17 }
  0x45   : > { %v497_v48 = vsub.f32 %v4006_v20, %v420_v38  ;;  %v498_v49 = vsub.f32 %v4011_v21, %v420_v38  ;;  %v527_v50 = vsub.f32 %v4040_v34, %v448_v24  ;;  %v528_v51 = vsub.f32 %v4045_v35, %v448_v24 }
  0x46   : > { %v347_v52 = vrot.slane %v319_v41, %v3996_v16  ;;  %v529_v53 = vsub.f32 %v4018_v26, %v452_v44  ;;  %v530_v54 = vsub.f32 %v4023_v27, %v452_v44  ;;  %v396_v55 = vrot.slane %v368_v45, %v3996_v16 }
  0x47   : > { %v552_v56 = vpack.c.bf16 %v496_v47, %v495_v46  ;;  %v568_v57 = vpack.c.bf16 %v528_v51, %v527_v50  ;;  %v553_v59 = vpack.c.bf16 %v498_v49, %v497_v48  ;;  %v499_v62 = vsub.f32 %v4028_v28, %v420_v38 }
  0x48   : > { %v424_v58 = vrot.slane %v347_v52, %v4000_v18  ;;  %v569_v60 = vpack.c.bf16 %v530_v54, %v529_v53  ;;  %v456_v61 = vrot.slane %v396_v55, %v4000_v18  ;;  %v500_v63 = vsub.f32 %v4035_v33, %v420_v38 }
  0x49   : > { %v531_v0 = vsub.f32 %v4040_v34, %v452_v44  ;;  %v532_v1 = vsub.f32 %v4045_v35, %v452_v44  ;;  %v349_v2 = vcombine.high %v333_v19, %v333_v19  ;;  %v398_v3 = vcombine.high %v382_v25, %v382_v25 }
  0x4a   : > { %v501_v16 = vsub.f32 %v4006_v20, %v424_v58  ;;  %v502_v5 = vsub.f32 %v4011_v21, %v424_v58  ;;  %v533_v6 = vsub.f32 %v4018_v26, %v456_v61  ;;  %v534_v7 = vsub.f32 %v4023_v27, %v456_v61 }
  0x4b   : > { %3554 = vmatmul.mubr.msk.bf16.gmra.mrb[8].mxu0 %vm586_vm2, %v550_v39  ;;  %3586 = vmatmul.mubr.msk.bf16.gmra.mrb[8].mxu1 %vm586_vm2, %v566_v40  ;;  %v554_v8 = vpack.c.bf16 %v500_v63, %v499_v62  ;;  %v570_v9 = vpack.c.bf16 %v532_v1, %v531_v0  ;;  %v428_v10 = vrot.slane %v349_v2, %v4000_v18  ;;  %v4177_v62 = vld [vmem:[%s5905_s4] ss:$0 sm:$0xff] }
  0x4c   : > { %3557 = vmatprep.mubr.msk.bf16.mxu0 %vm586_vm2, %v551_v42  ;;  %3589 = vmatprep.mubr.msk.bf16.mxu1 %vm586_vm2, %v567_v43  ;;  %v555_v12 = vpack.c.bf16 %v502_v5, %v501_v16  ;;  %v571_v13 = vpack.c.bf16 %v534_v7, %v533_v6  ;;  %v460_v14 = vrot.slane %v398_v3, %v4000_v18 }
  0x4d   : > { %v503_v15 = vsub.f32 %v4028_v28, %v424_v58  ;;  %v504_v17 = vsub.f32 %v4035_v33, %v424_v58  ;;  %v351_v19 = vcombine.high %v347_v52, %v347_v52  ;;  %v400_v22 = vcombine.high %v396_v55, %v396_v55 }
  0x4e   : > { %v535_v23 = vsub.f32 %v4040_v34, %v456_v61  ;;  %v536_v24 = vsub.f32 %v4045_v35, %v456_v61  ;;  %v505_v25 = vsub.f32 %v4006_v20, %v428_v10  ;;  %v506_v29 = vsub.f32 %v4011_v21, %v428_v10 }
  0x4f   : > { %v537_v30 = vsub.f32 %v4018_v26, %v460_v14  ;;  %v538_v31 = vsub.f32 %v4023_v27, %v460_v14  ;;  %v556_v32 = vpack.c.bf16 %v504_v17, %v503_v15  ;;  %v432_v37 = vrot.slane %v351_v19, %v4000_v18 }
  0x50   : > { %v572_v36 = vpack.c.bf16 %v536_v24, %v535_v23  ;;  %v557_v38 = vpack.c.bf16 %v506_v29, %v505_v25  ;;  %v464_v40 = vrot.slane %v400_v22, %v4000_v18  ;;  %v507_v41 = vsub.f32 %v4028_v28, %v428_v10 }
  0x51   : > { %v573_v39 = vpack.c.bf16 %v538_v31, %v537_v30  ;;  %v508_v42 = vsub.f32 %v4035_v33, %v428_v10  ;;  %v539_v43 = vsub.f32 %v4040_v34, %v460_v14  ;;  %v540_v44 = vsub.f32 %v4045_v35, %v460_v14 }
  0x52   : > { %v509_v45 = vsub.f32 %v4006_v20, %v432_v37  ;;  %v510_v46 = vsub.f32 %v4011_v21, %v432_v37  ;;  %v541_v47 = vsub.f32 %v4018_v26, %v464_v40  ;;  %v542_v48 = vsub.f32 %v4023_v27, %v464_v40 }
  0x53   : > { %3558 = vmatmul.mubr.msk.bf16.gmra.mrb[12].mxu0 %vm586_vm2, %v552_v56  ;;  %3590 = vmatmul.mubr.msk.bf16.gmra.mrb[12].mxu1 %vm586_vm2, %v568_v57  ;;  %v558_v49 = vpack.c.bf16 %v508_v42, %v507_v41  ;;  %v574_v50 = vpack.c.bf16 %v540_v44, %v539_v43  ;;  %v511_v53 = vsub.f32 %v4028_v28, %v432_v37  ;;  %v4168_v28 = vld [vmem:[%s5904_s3] ss:$0 sm:$0xff] }
  0x54   : > { %3561 = vmatprep.mubr.msk.bf16.mxu0 %vm586_vm2, %v553_v59  ;;  %3593 = vmatprep.mubr.msk.bf16.mxu1 %vm586_vm2, %v569_v60  ;;  %v559_v51 = vpack.c.bf16 %v510_v46, %v509_v45  ;;  %v575_v52 = vpack.c.bf16 %v542_v48, %v541_v47  ;;  %v512_v20 = vsub.f32 %v4035_v33, %v432_v37 }
  0x55   : > { %v543_v54 = vsub.f32 %v4040_v34, %v464_v40  ;;  %v544_v21 = vsub.f32 %v4045_v35, %v464_v40 }
  0x56   : > { %v560_v26 = vpack.c.bf16 %v512_v20, %v511_v53 }
  0x57   : > { %v576_v27 = vpack.c.bf16 %v544_v21, %v543_v54 }
  0x5b   : > { %3562 = vmatmul.mubr.msk.bf16.gmra.mrb[16].mxu0 %vm586_vm2, %v554_v8  ;;  %3594 = vmatmul.mubr.msk.bf16.gmra.mrb[16].mxu1 %vm586_vm2, %v570_v9 }
  0x5c   : > { %3565 = vmatprep.mubr.msk.bf16.mxu0 %vm586_vm2, %v555_v12  ;;  %3597 = vmatprep.mubr.msk.bf16.mxu1 %vm586_vm2, %v571_v13 }
  0x63   : > { %3566 = vmatmul.mubr.msk.bf16.gmra.mrb[20].mxu0 %vm586_vm2, %v556_v32  ;;  %3598 = vmatmul.mubr.msk.bf16.gmra.mrb[20].mxu1 %vm586_vm2, %v572_v36 }
  0x64   : > { %3569 = vmatprep.mubr.msk.bf16.mxu0 %vm586_vm2, %v557_v38  ;;  %3601 = vmatprep.mubr.msk.bf16.mxu1 %vm586_vm2, %v573_v39 }
  0x6b   : > { %3570 = vmatmul.mubr.msk.bf16.gmra.mrb[24].mxu0 %vm586_vm2, %v558_v49  ;;  %3602 = vmatmul.mubr.msk.bf16.gmra.mrb[24].mxu1 %vm586_vm2, %v574_v50 }
  0x6c   : > { %3573 = vmatprep.mubr.msk.bf16.mxu0 %vm586_vm2, %v559_v51  ;;  %3605 = vmatprep.mubr.msk.bf16.mxu1 %vm586_vm2, %v575_v52 }
  0x73   : > { %3574 = vmatmul.mubr.msk.bf16.gmra.mrb[28].mxu0 %vm586_vm2, %v560_v26  ;;  %3606 = vmatmul.mubr.msk.bf16.gmra.mrb[28].mxu1 %vm586_vm2, %v576_v27 }
 0x10e   : > { %v3547_v33 = vpop.f32.mrb[0].mxu0  ;;  %v3579_v55 = vpop.f32.mrb[0].mxu1 }
 0x10f   : > { %v733_v34 = vadd.f32 %v3547_v33, %v4168_v28  ;;  %v861_v35 = vadd.f32 %v3579_v55, %v4168_v28  ;;  %v724_v56 = vpop.f32.mrb[1].mxu0  ;;  %v852_v57 = vpop.f32.mrb[1].mxu1 }
 0x110   : > { %v725_v58 = vadd.f32 %v4168_v28, %v724_v56  ;;  %v853_v59 = vadd.f32 %v4168_v28, %v852_v57  ;;  %v3548_v60 = vpop.f32.mrb[2].mxu0  ;;  %v3580_v61 = vpop.f32.mrb[2].mxu1 }
 0x111   : > { %v981_v63 = vmax.f32 %v733_v34, 0.0  ;;  %v1013_v0 = vmax.f32 %v861_v35, 0.0  ;;  %v736_v1 = vadd.f32 %v3548_v60, %v4168_v28  ;;  %v864_v16 = vadd.f32 %v3580_v61, %v4168_v28  ;;  %v727_v2 = vpop.f32.mrb[3].mxu0  ;;  %v855_v3 = vpop.f32.mrb[3].mxu1 }
 0x112   : > { %v979_v5 = vmax.f32 %v725_v58, 0.0  ;;  %v856_v7 = vadd.f32 %v4168_v28, %v855_v3  ;;  %v1011_v10 = vmax.f32 %v853_v59, 0.0  ;;  %v728_v12 = vadd.f32 %v4168_v28, %v727_v2 }
 0x113   : > { %v982_v6 = vmax.f32 %v736_v1, 0.0  ;;  %v1084_v8 = vmul.f32 %v4177_v62, %v1013_v0  ;;  %v1052_v9 = vmul.f32 %v4177_v62, %v981_v63  ;;  %v1014_v14 = vmax.f32 %v864_v16, 0.0 }
 0x114   : > { %v1050_v13 = vmul.f32 %v4177_v62, %v979_v5  ;;  %v1012_v24 = vmax.f32 %v856_v7, 0.0  ;;  %v980_v36 = vmax.f32 %v728_v12, 0.0  ;;  %v1082_v41 = vmul.f32 %v4177_v62, %v1011_v10 }
 0x115   : > { %v1216_v15 = vsel %vm586_vm2, %v1084_v8, 0.0  ;;  %v1120_v17 = vsel %vm586_vm2, %v1052_v9, 0.0  ;;  %v1053_v19 = vmul.f32 %v4177_v62, %v982_v6  ;;  %v1085_v40 = vmul.f32 %v4177_v62, %v1014_v14 }
 0x116   : > { %1217 = vadd.xlane.f32.xlu0 %v1216_v15  ;;  %1121 = vadd.xlane.f32.xlu1 %v1120_v17  ;;  %v3551_v22 = vpop.f32.mrb[4].mxu0  ;;  %v3583_v23 = vpop.f32.mrb[4].mxu1  ;;  %v1114_v29 = vsel %vm586_vm2, %v1050_v13, 0.0  ;;  %v1083_v48 = vmul.f32 %v4177_v62, %v1012_v24  ;;  %v1051_v49 = vmul.f32 %v4177_v62, %v980_v36  ;;  %v1210_v52 = vsel %vm586_vm2, %v1082_v41, 0.0 }
 0x117   : > { %v1123_v25 = vsel %vm586_vm2, %v1053_v19, 0.0  ;;  %v749_v30 = vadd.f32 %v3551_v22, %v4168_v28  ;;  %v740_v31 = vpop.f32.mrb[5].mxu0  ;;  %v868_v32 = vpop.f32.mrb[5].mxu1  ;;  %v877_v44 = vadd.f32 %v3583_v23, %v4168_v28  ;;  %v1219_v51 = vsel %vm586_vm2, %v1085_v40, 0.0 }
 0x118   : > { %v3552_v37 = vpop.f32.mrb[6].mxu0  ;;  %v3584_v38 = vpop.f32.mrb[6].mxu1  ;;  %v741_v50 = vadd.f32 %v4168_v28, %v740_v31  ;;  %v869_v20 = vadd.f32 %v4168_v28, %v868_v32  ;;  %v1213_v27 = vsel %vm586_vm2, %v1083_v48, 0.0  ;;  %v1117_v58 = vsel %vm586_vm2, %v1051_v49, 0.0 }
 0x119   : > { %v752_v39 = vadd.f32 %v3552_v37, %v4168_v28  ;;  %v743_v42 = vpop.f32.mrb[7].mxu0  ;;  %v871_v43 = vpop.f32.mrb[7].mxu1  ;;  %v985_v45 = vmax.f32 %v749_v30, 0.0  ;;  %v880_v47 = vadd.f32 %v3584_v38, %v4168_v28  ;;  %v1017_v53 = vmax.f32 %v877_v44, 0.0 }
 0x11a   : > { %1124 = vadd.xlane.f32.xlu1 %v1123_v25  ;;  %1115 = vadd.xlane.f32.xlu0 %v1114_v29  ;;  %v744_v56 = vadd.f32 %v4168_v28, %v743_v42  ;;  %v872_v57 = vadd.f32 %v4168_v28, %v871_v43  ;;  %v983_v63 = vmax.f32 %v741_v50, 0.0  ;;  %v1015_v5 = vmax.f32 %v869_v20, 0.0 }
 0x11b   : > { %v986_v46 = vmax.f32 %v752_v39, 0.0  ;;  %v1018_v26 = vmax.f32 %v880_v47, 0.0  ;;  %v1056_v33 = vmul.f32 %v4177_v62, %v985_v45  ;;  %v1088_v6 = vmul.f32 %v4177_v62, %v1017_v53 }
 0x11c   : > { %v984_v14 = vmax.f32 %v744_v56, 0.0  ;;  %v1016_v15 = vmax.f32 %v872_v57, 0.0  ;;  %v1054_v29 = vmul.f32 %v4177_v62, %v983_v63  ;;  %v1086_v39 = vmul.f32 %v4177_v62, %v1015_v5 }
 0x11d   : > { %v1057_v55 = vmul.f32 %v4177_v62, %v986_v46  ;;  %v1132_v9 = vsel %vm586_vm2, %v1056_v33, 0.0  ;;  %v1089_v12 = vmul.f32 %v4177_v62, %v1018_v26  ;;  %v1228_v36 = vsel %vm586_vm2, %v1088_v6, 0.0 }
 0x11e   : > { %1220 = vadd.xlane.f32.xlu1 %v1219_v51  ;;  %1211 = vadd.xlane.f32.xlu0 %v1210_v52  ;;  %v3555_v54 = vpop.f32.mrb[8].mxu0  ;;  %v3587_v21 = vpop.f32.mrb[8].mxu1  ;;  %v1055_v42 = vmul.f32 %v4177_v62, %v984_v14  ;;  %v1087_v43 = vmul.f32 %v4177_v62, %v1016_v15 }
 0x11f   : > { %v756_v34 = vpop.f32.mrb[9].mxu0  ;;  %v884_v35 = vpop.f32.mrb[9].mxu1  ;;  %v765_v59 = vadd.f32 %v3555_v54, %v4168_v28  ;;  %v893_v16 = vadd.f32 %v3587_v21, %v4168_v28  ;;  %v1135_v10 = vsel %vm586_vm2, %v1057_v55, 0.0  ;;  %v1231_v37 = vsel %vm586_vm2, %v1089_v12, 0.0 }
 0x120   : > { %v3556_v60 = vpop.f32.mrb[10].mxu0  ;;  %v3588_v61 = vpop.f32.mrb[10].mxu1  ;;  %v757_v0 = vadd.f32 %v4168_v28, %v756_v34  ;;  %v885_v2 = vadd.f32 %v4168_v28, %v884_v35  ;;  %v1126_v54 = vsel %vm586_vm2, %v1054_v29, 0.0  ;;  %v1222_v21 = vsel %vm586_vm2, %v1086_v39, 0.0 }
 0x121   : > { %v759_v1 = vpop.f32.mrb[11].mxu0  ;;  %v887_v3 = vpop.f32.mrb[11].mxu1  ;;  %v768_v7 = vadd.f32 %v3556_v60, %v4168_v28  ;;  %v896_v8 = vadd.f32 %v3588_v61, %v4168_v28  ;;  %v989_v17 = vmax.f32 %v765_v59, 0.0  ;;  %v1021_v22 = vmax.f32 %v893_v16, 0.0 }
 0x122   : > { %1214 = vadd.xlane.f32.xlu1 %v1213_v27  ;;  %1118 = vadd.xlane.f32.xlu0 %v1117_v58  ;;  %v760_v13 = vadd.f32 %v4168_v28, %v759_v1  ;;  %v987_v19 = vmax.f32 %v757_v0, 0.0  ;;  %v1019_v23 = vmax.f32 %v885_v2, 0.0  ;;  %v888_v24 = vadd.f32 %v4168_v28, %v887_v3 }
 0x123   : > { %v990_v25 = vmax.f32 %v768_v7, 0.0  ;;  %v1022_v30 = vmax.f32 %v896_v8, 0.0  ;;  %v1060_v44 = vmul.f32 %v4177_v62, %v989_v17  ;;  %v1092_v48 = vmul.f32 %v4177_v62, %v1021_v22 }
 0x124   : > { %v988_v38 = vmax.f32 %v760_v13, 0.0  ;;  %v1020_v47 = vmax.f32 %v888_v24, 0.0  ;;  %v1058_v49 = vmul.f32 %v4177_v62, %v987_v19  ;;  %v1090_v52 = vmul.f32 %v4177_v62, %v1019_v23 }
 0x125   : > { %v1061_v53 = vmul.f32 %v4177_v62, %v990_v25  ;;  %v1093_v20 = vmul.f32 %v4177_v62, %v1022_v30  ;;  %v1129_v33 = vsel %vm586_vm2, %v1055_v42, 0.0  ;;  %v1225_v55 = vsel %vm586_vm2, %v1087_v43, 0.0 }
 0x126   : > { %1133 = vadd.xlane.f32.xlu0 %v1132_v9  ;;  %1136 = vadd.xlane.f32.xlu1 %v1135_v10  ;;  %v3559_v31 = vpop.f32.mrb[12].mxu0  ;;  %v3591_v32 = vpop.f32.mrb[12].mxu1  ;;  %v1059_v27 = vmul.f32 %v4177_v62, %v988_v38  ;;  %v1144_v34 = vsel %vm586_vm2, %v1060_v44, 0.0  ;;  %v4252_v56 = vsel %vm586_vm2, %v1092_v48, 0.0  ;;  %v4255_v57 = vsel %vm586_vm2, %v1058_v49, 0.0 }
 0x127   : > { %v772_v40 = vpop.f32.mrb[13].mxu0  ;;  %v4225_v41 = vpop.f32.mrb[13].mxu1  ;;  %v4242_v26 = vadd.f32 %v3559_v31, %v4168_v28  ;;  %v1091_v58 = vmul.f32 %v4177_v62, %v1020_v47  ;;  %v4259_v59 = vsel %vm586_vm2, %v1090_v52, 0.0  ;;  %v1147_v60 = vsel %vm586_vm2, %v1061_v53, 0.0 }
 0x128   : > { %v3560_v45 = vpop.f32.mrb[14].mxu0  ;;  %v3592_v46 = vpop.f32.mrb[14].mxu1  ;;  %v4263_v61 = vsel %vm586_vm2, %v1093_v20, 0.0  ;;  %v4266_v63 = vadd.f32 %v4168_v28, %v772_v40  ;;  %v4269_v0 = vadd.f32 %v3591_v32, %v4168_v28  ;;  %v4273_v3 = vsel %vm586_vm2, %v1059_v27, 0.0 }
 0x129   : > { %v4232_v50 = vpop.f32.mrb[15].mxu0  ;;  %v4234_v51 = vpop.f32.mrb[15].mxu1  ;;  %v4249_v35 = vadd.f32 %v3560_v45, %v4168_v28  ;;  %v993_v2 = vmax.f32 %v4242_v26, 0.0  ;;  %v4279_v10 = vadd.f32 %v3592_v46, %v4168_v28  ;;  %v4301_v45 = vadd.f32 %v4168_v28, %v4225_v41 }
 0x12a   : > { %1229 = vadd.xlane.f32.xlu0 %v1228_v36  ;;  %1232 = vadd.xlane.f32.xlu1 %v1231_v37  ;;  %v4304_v46 = vsel %vm586_vm2, %v1091_v58, 0.0  ;;  %v991_v49 = vmax.f32 %v4266_v63, 0.0  ;;  %v1025_v52 = vmax.f32 %v4269_v0, 0.0 }
 0x12b   : > { %v994_v9 = vmax.f32 %v4249_v35, 0.0  ;;  %v1026_v26 = vmax.f32 %v4279_v10, 0.0  ;;  %v1064_v35 = vmul.f32 %v4177_v62, %v993_v2 }
 0x12d   : > { %v1065_v58 = vmul.f32 %v4177_v62, %v994_v9 }
 0x12e   : > { %1130 = vadd.xlane.f32.xlu1 %v1129_v33  ;;  %1127 = vadd.xlane.f32.xlu0 %v1126_v54  ;;  %v3563_v1 = vpop.f32.mrb[16].mxu0  ;;  %v3595_v16 = vpop.f32.mrb[16].mxu1 }
 0x12f   : > { %v797_v5 = vadd.f32 %v3563_v1, %v4168_v28  ;;  %v788_v6 = vpop.f32.mrb[17].mxu0  ;;  %v925_v7 = vadd.f32 %v3595_v16, %v4168_v28  ;;  %v916_v8 = vpop.f32.mrb[17].mxu1 }
 0x130   : > { %v789_v12 = vadd.f32 %v4168_v28, %v788_v6  ;;  %v3564_v13 = vpop.f32.mrb[18].mxu0  ;;  %v917_v14 = vadd.f32 %v4168_v28, %v916_v8  ;;  %v3596_v15 = vpop.f32.mrb[18].mxu1 }
 0x131   : > { %v997_v17 = vmax.f32 %v797_v5, 0.0  ;;  %v800_v19 = vadd.f32 %v3564_v13, %v4168_v28  ;;  %v791_v22 = vpop.f32.mrb[19].mxu0  ;;  %v1029_v23 = vmax.f32 %v925_v7, 0.0  ;;  %v928_v24 = vadd.f32 %v3596_v15, %v4168_v28  ;;  %v919_v25 = vpop.f32.mrb[19].mxu1 }
 0x132   : > { %1226 = vadd.xlane.f32.xlu1 %v1225_v55  ;;  %1223 = vadd.xlane.f32.xlu0 %v1222_v21  ;;  %v995_v29 = vmax.f32 %v789_v12, 0.0  ;;  %v792_v30 = vadd.f32 %v4168_v28, %v791_v22  ;;  %v1027_v31 = vmax.f32 %v917_v14, 0.0  ;;  %v920_v32 = vadd.f32 %v4168_v28, %v919_v25 }
 0x133   : > { %v998_v36 = vmax.f32 %v800_v19, 0.0  ;;  %v1030_v37 = vmax.f32 %v928_v24, 0.0  ;;  %v4288_v38 = vmul.f32 %v4177_v62, %v997_v17  ;;  %v4291_v39 = vmul.f32 %v4177_v62, %v1029_v23 }
 0x134   : > { %v996_v40 = vmax.f32 %v792_v30, 0.0  ;;  %v1028_v42 = vmax.f32 %v920_v32, 0.0  ;;  %v4294_v43 = vmul.f32 %v4177_v62, %v995_v29  ;;  %v4297_v44 = vmul.f32 %v4177_v62, %v1027_v31 }
 0x135   : > { %v4307_v47 = vmul.f32 %v4177_v62, %v998_v36  ;;  %v4310_v48 = vmul.f32 %v4177_v62, %v1030_v37  ;;  %v4322_v21 = vadd.f32 %v4168_v28, %v4232_v50  ;;  %v1023_v23 = vmax.f32 %v4301_v45, 0.0 }
 0x136   : > { %1148 = vadd.xlane.f32.xlu1 %v1147_v60  ;;  %1145 = vadd.xlane.f32.xlu0 %v1144_v34  ;;  %v3567_v53 = vpop.f32.mrb[20].mxu0  ;;  %v4315_v20 = vmul.f32 %v4177_v62, %v996_v40  ;;  %v3599_v41 = vpop.f32.mrb[20].mxu1  ;;  %v4318_v54 = vmul.f32 %v4177_v62, %v1028_v42  ;;  %v4352_v24 = vadd.f32 %v4168_v28, %v4234_v51  ;;  %v1156_v40 = vsel %vm586_vm2, %v1064_v35, 0.0 }
 0x137   : > { %v813_v27 = vadd.f32 %v3567_v53, %v4168_v28  ;;  %v804_v33 = vpop.f32.mrb[21].mxu0  ;;  %v941_v55 = vadd.f32 %v3599_v41, %v4168_v28  ;;  %v932_v34 = vpop.f32.mrb[21].mxu1  ;;  %v992_v30 = vmax.f32 %v4322_v21, 0.0  ;;  %v1096_v31 = vmul.f32 %v4177_v62, %v1025_v52 }
 0x138   : > { %v805_v60 = vadd.f32 %v4168_v28, %v804_v33  ;;  %v3568_v63 = vpop.f32.mrb[22].mxu0  ;;  %v933_v0 = vadd.f32 %v4168_v28, %v932_v34  ;;  %v3600_v1 = vpop.f32.mrb[22].mxu1  ;;  %v1062_v42 = vmul.f32 %v4177_v62, %v991_v49  ;;  %v1159_v52 = vsel %vm586_vm2, %v1065_v58, 0.0 }
 0x139   : > { %v1001_v50 = vmax.f32 %v813_v27, 0.0  ;;  %v816_v16 = vadd.f32 %v3568_v63, %v4168_v28  ;;  %v807_v5 = vpop.f32.mrb[23].mxu0  ;;  %v1033_v6 = vmax.f32 %v941_v55, 0.0  ;;  %v944_v7 = vadd.f32 %v3600_v1, %v4168_v28  ;;  %v935_v8 = vpop.f32.mrb[23].mxu1 }
 0x13a   : > { %1244 = vadd.xlane.f32.xlu1 %v4263_v61  ;;  %1241 = vadd.xlane.f32.xlu0 %v4252_v56  ;;  %v999_v2 = vmax.f32 %v805_v60, 0.0  ;;  %v808_v9 = vadd.f32 %v4168_v28, %v807_v5  ;;  %v1031_v10 = vmax.f32 %v933_v0, 0.0  ;;  %v936_v12 = vadd.f32 %v4168_v28, %v935_v8 }
 0x13b   : > { %v1002_v13 = vmax.f32 %v816_v16, 0.0  ;;  %v1034_v14 = vmax.f32 %v944_v7, 0.0  ;;  %v4338_v15 = vmul.f32 %v4177_v62, %v1001_v50  ;;  %v4341_v17 = vmul.f32 %v4177_v62, %v1033_v6 }
 0x13c   : > { %v1000_v19 = vmax.f32 %v808_v9, 0.0  ;;  %v1032_v22 = vmax.f32 %v936_v12, 0.0  ;;  %v4344_v61 = vmul.f32 %v4177_v62, %v999_v2  ;;  %v4347_v56 = vmul.f32 %v4177_v62, %v1031_v10 }
 0x13d   : > { %v4355_v25 = vmul.f32 %v4177_v62, %v1002_v13  ;;  %v4358_v29 = vmul.f32 %v4177_v62, %v1034_v14  ;;  %v1097_v41 = vmul.f32 %v4177_v62, %v1026_v26  ;;  %v1024_v12 = vmax.f32 %v4352_v24, 0.0 }
 0x13e   : > { %1142 = vadd.xlane.f32.xlu1 %v4273_v3  ;;  %1139 = vadd.xlane.f32.xlu0 %v4255_v57  ;;  %v3571_v32 = vpop.f32.mrb[24].mxu0  ;;  %v4365_v36 = vmul.f32 %v4177_v62, %v1000_v19  ;;  %v3603_v51 = vpop.f32.mrb[24].mxu1  ;;  %v4368_v37 = vmul.f32 %v4177_v62, %v1032_v22  ;;  %v1094_v13 = vmul.f32 %v4177_v62, %v1023_v23 }
 0x13f   : > { %v829_v3 = vadd.f32 %v3571_v32, %v4168_v28  ;;  %v820_v45 = vpop.f32.mrb[25].mxu0  ;;  %v957_v57 = vadd.f32 %v3603_v51, %v4168_v28  ;;  %v948_v53 = vpop.f32.mrb[25].mxu1  ;;  %v1252_v51 = vsel %vm586_vm2, %v1096_v31, 0.0  ;;  %v1063_v23 = vmul.f32 %v4177_v62, %v992_v30 }
 0x140   : > { %v821_v21 = vadd.f32 %v4168_v28, %v820_v45  ;;  %v3572_v27 = vpop.f32.mrb[26].mxu0  ;;  %v949_v33 = vadd.f32 %v4168_v28, %v948_v53  ;;  %v3604_v55 = vpop.f32.mrb[26].mxu1  ;;  %v1150_v53 = vsel %vm586_vm2, %v1062_v42, 0.0 }
 0x141   : > { %v1005_v34 = vmax.f32 %v829_v3, 0.0  ;;  %v832_v35 = vadd.f32 %v3572_v27, %v4168_v28  ;;  %v823_v49 = vpop.f32.mrb[27].mxu0  ;;  %v1037_v60 = vmax.f32 %v957_v57, 0.0  ;;  %v960_v63 = vadd.f32 %v3604_v55, %v4168_v28  ;;  %v951_v0 = vpop.f32.mrb[27].mxu1 }
 0x142   : > { %1238 = vadd.xlane.f32.xlu1 %v4304_v46  ;;  %1235 = vadd.xlane.f32.xlu0 %v4259_v59  ;;  %v1003_v58 = vmax.f32 %v821_v21, 0.0  ;;  %v824_v26 = vadd.f32 %v4168_v28, %v823_v49  ;;  %v1035_v1 = vmax.f32 %v949_v33, 0.0  ;;  %v952_v50 = vadd.f32 %v4168_v28, %v951_v0 }
 0x143   : > { %v1006_v16 = vmax.f32 %v832_v35, 0.0  ;;  %v1038_v5 = vmax.f32 %v960_v63, 0.0  ;;  %v4385_v6 = vmul.f32 %v4177_v62, %v1005_v34  ;;  %v4388_v7 = vmul.f32 %v4177_v62, %v1037_v60 }
 0x144   : > { %v1004_v8 = vmax.f32 %v824_v26, 0.0  ;;  %v1036_v2 = vmax.f32 %v952_v50, 0.0  ;;  %v4391_v46 = vmul.f32 %v4177_v62, %v1003_v58  ;;  %v4394_v59 = vmul.f32 %v4177_v62, %v1035_v1 }
 0x145   : > { %v4397_v9 = vmul.f32 %v4177_v62, %v1006_v16  ;;  %v4400_v10 = vmul.f32 %v4177_v62, %v1038_v5  ;;  %v1255_v3 = vsel %vm586_vm2, %v1097_v41, 0.0 }
 0x146   : > { %1157 = vadd.xlane.f32.xlu0 %v1156_v40  ;;  %1160 = vadd.xlane.f32.xlu1 %v1159_v52  ;;  %v3575_v14 = vpop.f32.mrb[28].mxu0  ;;  %v4405_v19 = vmul.f32 %v4177_v62, %v1004_v8  ;;  %v3607_v22 = vpop.f32.mrb[28].mxu1  ;;  %v4408_v32 = vmul.f32 %v4177_v62, %v1036_v2  ;;  %v1153_v2 = vsel %vm586_vm2, %v1063_v23, 0.0  ;;  %v1267_v23 = vsel %vm586_vm2, %v4310_v48, 0.0 }
 0x147   : > { %v845_v45 = vadd.f32 %v3575_v14, %v4168_v28  ;;  %v836_v57 = vpop.f32.mrb[29].mxu0  ;;  %v973_v24 = vadd.f32 %v3607_v22, %v4168_v28  ;;  %v964_v40 = vpop.f32.mrb[29].mxu1  ;;  %v1183_v48 = vsel %vm586_vm2, %v4355_v25, 0.0  ;;  %v1270_v25 = vsel %vm586_vm2, %v4347_v56, 0.0 }
 0x148   : > { %v837_v52 = vadd.f32 %v4168_v28, %v836_v57  ;;  %v3576_v21 = vpop.f32.mrb[30].mxu0  ;;  %v965_v27 = vadd.f32 %v4168_v28, %v964_v40  ;;  %v3608_v33 = vpop.f32.mrb[30].mxu1  ;;  %v1171_v40 = vsel %vm586_vm2, %v4307_v47, 0.0  ;;  %v1258_v47 = vsel %vm586_vm2, %v4297_v44, 0.0 }
 0x149   : > { %v1009_v55 = vmax.f32 %v845_v45, 0.0  ;;  %v848_v31 = vadd.f32 %v3576_v21, %v4168_v28  ;;  %v839_v41 = vpop.f32.mrb[31].mxu0  ;;  %v1041_v34 = vmax.f32 %v973_v24, 0.0  ;;  %v976_v35 = vadd.f32 %v3608_v33, %v4168_v28  ;;  %v967_v49 = vpop.f32.mrb[31].mxu1 }
 0x14a   : > { %1253 = vadd.xlane.f32.xlu0 %v1252_v51  ;;  %1256 = vadd.xlane.f32.xlu1 %v1255_v3  ;;  %v1007_v60 = vmax.f32 %v837_v52, 0.0  ;;  %v840_v30 = vadd.f32 %v4168_v28, %v839_v41  ;;  %v1039_v42 = vmax.f32 %v965_v27, 0.0  ;;  %v968_v63 = vadd.f32 %v4168_v28, %v967_v49 }
 0x14b   : > { %v1010_v0 = vmax.f32 %v848_v31, 0.0  ;;  %v1042_v58 = vmax.f32 %v976_v35, 0.0  ;;  %v4423_v26 = vmul.f32 %v4177_v62, %v1009_v55  ;;  %v4426_v1 = vmul.f32 %v4177_v62, %v1041_v34  ;;  %v3505_v55 = vld [vmem:[#allocation2] ss:$0 sm:$0xff] }
 0x14c   : > { %v1008_v50 = vmax.f32 %v840_v30, 0.0  ;;  %v1040_v16 = vmax.f32 %v968_v63, 0.0  ;;  %v4429_v5 = vmul.f32 %v4177_v62, %v1007_v60  ;;  %v4432_v8 = vmul.f32 %v4177_v62, %v1039_v42 }
 0x14d   : > { %v1095_v28 = vmul.f32 %v4177_v62, %v1024_v12  ;;  %v1081_v14 = vmul.f32 %v4177_v62, %v1010_v0  ;;  %v4438_v22 = vmul.f32 %v4177_v62, %v1042_v58  ;;  %v3886_v45 = vmov 0  }
 0x14e   : > { %1154 = vadd.xlane.f32.xlu1 %v1153_v2  ;;  %1151 = vadd.xlane.f32.xlu0 %v1150_v53  ;;  %v4441_v51 = vmul.f32 %v4177_v62, %v1008_v50  ;;  %v4444_v3 = vmul.f32 %v4177_v62, %v1040_v16  ;;  %v1246_v12 = vsel %vm586_vm2, %v1094_v13, 0.0  ;;  %v1168_v24 = vsel %vm586_vm2, %v4288_v38, 0.0 }
 0x14f   : > { %3656 = vset.pattern.permute.xlu0 %v3886_v45  ;;  %3657 = vset.pattern.permute.xlu1 %v3886_v45  ;;  %v1249_v57 = vsel %vm586_vm2, %v1095_v28, 0.0  ;;  %v1264_v62 = vsel %vm586_vm2, %v4291_v39, 0.0  ;;  %v1165_v13 = vsel %vm586_vm2, %v4315_v20, 0.0  ;;  %v1162_v53 = vsel %vm586_vm2, %v4294_v43, 0.0 }
 0x150   : > { %v1261_v38 = vsel %vm586_vm2, %v4318_v54, 0.0  ;;  %v1180_v39 = vsel %vm586_vm2, %v4338_v15, 0.0  ;;  %v1276_v43 = vsel %vm586_vm2, %v4341_v17, 0.0  ;;  %v1279_v20 = vsel %vm586_vm2, %v4358_v29, 0.0 }
 0x151   : > { %v1177_v44 = vsel %vm586_vm2, %v4365_v36, 0.0  ;;  %v1174_v54 = vsel %vm586_vm2, %v4344_v61, 0.0  ;;  %v1273_v15 = vsel %vm586_vm2, %v4368_v37, 0.0  ;;  %v1195_v17 = vsel %vm586_vm2, %v4397_v9, 0.0 }
 0x152   : > { %1250 = vadd.xlane.f32.xlu1 %v1249_v57  ;;  %1247 = vadd.xlane.f32.xlu0 %v1246_v12  ;;  %v1192_v29 = vsel %vm586_vm2, %v4385_v6, 0.0  ;;  %v1291_v61 = vsel %vm586_vm2, %v4400_v10, 0.0  ;;  %v1288_v36 = vsel %vm586_vm2, %v4388_v7, 0.0  ;;  %v1189_v56 = vsel %vm586_vm2, %v4405_v19, 0.0 }
 0x153   : > { %v1186_v37 = vsel %vm586_vm2, %v4391_v46, 0.0  ;;  %v1285_v6 = vsel %vm586_vm2, %v4408_v32, 0.0  ;;  %v1282_v9 = vsel %vm586_vm2, %v4394_v59, 0.0  ;;  %v1204_v7 = vsel %vm586_vm2, %v4423_v26, 0.0 }
 0x154   : > { %v1207_v10 = vsel %vm586_vm2, %v1081_v14, 0.0  ;;  %v1300_v46 = vsel %vm586_vm2, %v4426_v1, 0.0  ;;  %v1303_v19 = vsel %vm586_vm2, %v4438_v22, 0.0  ;;  %v1201_v59 = vsel %vm586_vm2, %v4441_v51, 0.0 }
 0x155   : > { %v1198_v32 = vsel %vm586_vm2, %v4429_v5, 0.0  ;;  %v1297_v52 = vsel %vm586_vm2, %v4444_v3, 0.0  ;;  %v1294_v21 = vsel %vm586_vm2, %v4432_v8, 0.0 }
 0x156   : > { %1169 = vadd.xlane.f32.xlu0 %v1168_v24  ;;  %1172 = vadd.xlane.f32.xlu1 %v1171_v40 }
 0x15a   : > { %1265 = vadd.xlane.f32.xlu0 %v1264_v62  ;;  %1268 = vadd.xlane.f32.xlu1 %v1267_v23 }
 0x15e   : > { %1166 = vadd.xlane.f32.xlu1 %v1165_v13  ;;  %1163 = vadd.xlane.f32.xlu0 %v1162_v53 }
 0x162   : > { %1262 = vadd.xlane.f32.xlu1 %v1261_v38  ;;  %1259 = vadd.xlane.f32.xlu0 %v1258_v47 }
 0x166   : > { %1181 = vadd.xlane.f32.xlu0 %v1180_v39  ;;  %1184 = vadd.xlane.f32.xlu1 %v1183_v48 }
 0x16a   : > { %1277 = vadd.xlane.f32.xlu0 %v1276_v43  ;;  %1280 = vadd.xlane.f32.xlu1 %v1279_v20 }
 0x16e   : > { %1178 = vadd.xlane.f32.xlu1 %v1177_v44  ;;  %1175 = vadd.xlane.f32.xlu0 %v1174_v54 }
 0x172   : > { %1274 = vadd.xlane.f32.xlu1 %v1273_v15  ;;  %1271 = vadd.xlane.f32.xlu0 %v1270_v25 }
 0x176   : > { %1196 = vadd.xlane.f32.xlu1 %v1195_v17  ;;  %1193 = vadd.xlane.f32.xlu0 %v1192_v29 }
 0x17a   : > { %1292 = vadd.xlane.f32.xlu1 %v1291_v61  ;;  %1289 = vadd.xlane.f32.xlu0 %v1288_v36 }
 0x17e   : > { %1190 = vadd.xlane.f32.xlu1 %v1189_v56  ;;  %1187 = vadd.xlane.f32.xlu0 %v1186_v37 }
 0x182   : > { %1286 = vadd.xlane.f32.xlu1 %v1285_v6  ;;  %1283 = vadd.xlane.f32.xlu0 %v1282_v9 }
 0x186   : > { %1205 = vadd.xlane.f32.xlu0 %v1204_v7  ;;  %1208 = vadd.xlane.f32.xlu1 %v1207_v10 }
 0x18a   : > { %1301 = vadd.xlane.f32.xlu0 %v1300_v46  ;;  %1304 = vadd.xlane.f32.xlu1 %v1303_v19 }
 0x18e   : > { %1202 = vadd.xlane.f32.xlu1 %v1201_v59  ;;  %1199 = vadd.xlane.f32.xlu0 %v1198_v32 }
 0x192   : > { %1298 = vadd.xlane.f32.xlu1 %v1297_v52  ;;  %1295 = vadd.xlane.f32.xlu0 %v1294_v21  ;;  %v1445_v21 = vand.u32 127, %v307_v4 }
 0x194   : > { %v1450_v18 = vadd.s32 4294967288, %v1445_v21 }
 0x1a3   : > { %v4511_v27 = vpop.xlane.xlu0 %1217  ;;  %v4513_v33 = vpop.xlane.xlu1 %1121 }
 0x1a7   : > { %v4515_v31 = vpop.xlane.xlu1 %1124  ;;  %v4517_v41 = vpop.xlane.xlu0 %1115 }
 0x1a8   : > { %1313 = vperm.xlu0 %3656, %v3505_v55  }
 0x1ab   : > { %v4519_v34 = vpop.xlane.xlu1 %1220  ;;  %v4521_v35 = vpop.xlane.xlu0 %1211 }
 0x1af   : > { %v4523_v49 = vpop.xlane.xlu1 %1214  ;;  %v4525_v60 = vpop.xlane.xlu0 %1118 }
 0x1b3   : > { %v4527_v30 = vpop.xlane.xlu0 %1133  ;;  %v4529_v42 = vpop.xlane.xlu1 %1136 }
 0x1b7   : > { %v4531_v63 = vpop.xlane.xlu0 %1229  ;;  %v4533_v0 = vpop.xlane.xlu1 %1232 }
 0x1bb   : > { %v4535_v58 = vpop.xlane.xlu1 %1130  ;;  %v4537_v26 = vpop.xlane.xlu0 %1127 }
 0x1bf   : > { %v4539_v1 = vpop.xlane.xlu1 %1226  ;;  %v4541_v50 = vpop.xlane.xlu0 %1223 }
 0x1c3   : > { %v4543_v16 = vpop.xlane.xlu1 %1148  ;;  %v4545_v5 = vpop.xlane.xlu0 %1145 }
 0x1c7   : > { %v4547_v8 = vpop.xlane.xlu1 %1244  ;;  %v4549_v2 = vpop.xlane.xlu0 %1241 }
 0x1cb   : > { %v1143_v28 = vpop.xlane.xlu1 %1142  ;;  %v1140_v14 = vpop.xlane.xlu0 %1139 }
 0x1cf   : > { %v4551_v22 = vpop.xlane.xlu1 %1238  ;;  %v4553_v51 = vpop.xlane.xlu0 %1235 }
 0x1d3   : > { %v4555_v3 = vpop.xlane.xlu0 %1157  ;;  %v4557_v45 = vpop.xlane.xlu1 %1160 }
 0x1d7   : > { %v4559_v57 = vpop.xlane.xlu0 %1253  ;;  %v4561_v12 = vpop.xlane.xlu1 %1256 }
 0x1db   : > { %v1155_v24 = vpop.xlane.xlu1 %1154  ;;  %v1152_v40 = vpop.xlane.xlu0 %1151 }
 0x1df   : > { %v4563_v62 = vpop.xlane.xlu1 %1250  ;;  %v4565_v23 = vpop.xlane.xlu0 %1247 }
 0x1e3   : > { %v1170_v13 = vpop.xlane.xlu0 %1169  ;;  %v1173_v53 = vpop.xlane.xlu1 %1172 }
 0x1e7   : > { %v4567_v38 = vpop.xlane.xlu0 %1265  ;;  %v4569_v47 = vpop.xlane.xlu1 %1268 }
 0x1eb   : > { %v1167_v39 = vpop.xlane.xlu1 %1166  ;;  %v1164_v48 = vpop.xlane.xlu0 %1163 }
 0x1ef   : > { %v4571_v43 = vpop.xlane.xlu0 %1259  ;;  %v4573_v20 = vpop.xlane.xlu1 %1262 }
 0x1f3   : > { %v1182_v44 = vpop.xlane.xlu0 %1181  ;;  %v1185_v54 = vpop.xlane.xlu1 %1184 }
 0x1f7   : > { %v4575_v15 = vpop.xlane.xlu0 %1277  ;;  %v4577_v17 = vpop.xlane.xlu1 %1280 }
 0x1f8   : > { %5996 = vst [vmem:[#allocation9_spill] sm:$0xff] %v4575_v15  ;;  %5997 = vst [vmem:[#allocation10_spill] sm:$0xff] %v4577_v17  ;;  %v1464_v17 = vadd.s32 4294967272, %v1445_v21 }
 0x1fb   : > { %v1176_v25 = vpop.xlane.xlu0 %1175  ;;  %v1179_v61 = vpop.xlane.xlu1 %1178 }
 0x1ff   : > { %v4579_v29 = vpop.xlane.xlu0 %1271  ;;  %v4583_v37 = vpop.xlane.xlu1 %1274 }
 0x200   : > { %5998 = vst [vmem:[#allocation11_spill] sm:$0xff] %v4579_v29  ;;  %6000 = vst [vmem:[#allocation13_spill] sm:$0xff] %v4583_v37 }
 0x203   : > { %v1194_v36 = vpop.xlane.xlu0 %1193  ;;  %v1197_v9 = vpop.xlane.xlu1 %1196 }
 0x207   : > { %v4581_v56 = vpop.xlane.xlu0 %1289  ;;  %v4589_v46 = vpop.xlane.xlu1 %1292 }
 0x208   : > { %5999 = vst [vmem:[#allocation12_spill] sm:$0xff] %v4581_v56  ;;  %6002 = vst [vmem:[#allocation15_spill] sm:$0xff] %v4589_v46  ;;  %v1457_v56 = vadd.s32 4294967280, %v1445_v21  ;;  %v4604_v46 = vsub.s32 %v1450_v18, %v3992_v11 }
 0x20b   : > { %v1188_v6 = vpop.xlane.xlu0 %1187  ;;  %v1191_v59 = vpop.xlane.xlu1 %1190 }
 0x20f   : > { %v4585_v7 = vpop.xlane.xlu0 %1283  ;;  %v4593_v52 = vpop.xlane.xlu1 %1286 }
 0x210   : > { %6001 = vst [vmem:[#allocation14_spill] sm:$0xff] %v4585_v7  ;;  %6004 = vst [vmem:[#allocation17_spill] sm:$0xff] %v4593_v52  ;;  %v4601_v7 = vsub.s32 %v1445_v21, %v3992_v11  ;;  %v4610_v52 = vsub.s32 %v1464_v17, %v3992_v11 }
 0x213   : > { %v4587_v10 = vpop.xlane.xlu0 %1205  ;;  %v1209_v15 = vpop.xlane.xlu1 %1208 }
 0x217   : > { %v4591_v19 = vpop.xlane.xlu0 %1301 }
 0x218   : > { %6003 = vst [vmem:[#allocation16_spill] sm:$0xff] %v4591_v19  ;;  %v4607_v19 = vsub.s32 %v1457_v56, %v3992_v11  ;;  %v4644_v56 = vpop.xlane.xlu1 %1304 }
 0x219   : > { %6012 = vst [vmem:[#allocation25_spill] sm:$0xff] %v4644_v56 }
 0x21b   : > { %v1200_v32 = vpop.xlane.xlu0 %1199 }
 0x21f   : > { %v4596_v55 = vpop.xlane.xlu0 %1295 }
 0x220   : > { %6005 = vst [vmem:[#allocation18_spill] sm:$0xff] %v4596_v55 }
 0x227   : > { %v4598_v37 = vpop.permute.xlu0 %1313 }
 0x228   : > { %v4614_v4 = vadd.f32 %v4598_v37, %v4517_v41  ;;  %v4618_v55 = vadd.f32 %v4598_v37, %v4525_v60  ;;  %v4622_v21 = vadd.f32 %v4598_v37, %v4513_v33  ;;  %v4626_v18 = vadd.f32 %v4598_v37, %v4515_v31 }
 0x229   : > { %v4630_v17 = vadd.f32 %v4598_v37, %v4537_v26  ;;  %v4634_v41 = vadd.f32 %v4598_v37, %v4535_v58  ;;  %v4638_v60 = vadd.f32 %v4598_v37, %v4527_v30  ;;  %v4642_v33 = vadd.f32 %v4598_v37, %v4529_v42 }
 0x22a   : > { %6006 = vst [vmem:[#allocation19_spill] sm:$0xff] %v4614_v4  ;;  %6007 = vst [vmem:[#allocation20_spill] sm:$0xff] %v4618_v55  ;;  %v4647_v31 = vadd.f32 %v4598_v37, %v1140_v14  ;;  %v4650_v26 = vadd.f32 %v4598_v37, %v1143_v28  ;;  %v4654_v58 = vadd.f32 %v4598_v37, %v4545_v5 }
 0x22b   : > { %6008 = vst [vmem:[#allocation21_spill] sm:$0xff] %v4622_v21  ;;  %6009 = vst [vmem:[#allocation22_spill] sm:$0xff] %v4630_v17  ;;  %v4658_v30 = vadd.f32 %v4598_v37, %v4543_v16  ;;  %v4661_v11 = vadd.f32 %v4598_v37, %v1152_v40  ;;  %v4664_v42 = vadd.f32 %v4598_v37, %v1155_v24 }
 0x22c   : > { %6010 = vst [vmem:[#allocation23_spill] sm:$0xff] %v4634_v41  ;;  %6011 = vst [vmem:[#allocation24_spill] sm:$0xff] %v4642_v33  ;;  %v4668_v14 = vadd.f32 %v4598_v37, %v4555_v3  ;;  %v4672_v28 = vadd.f32 %v4598_v37, %v4557_v45  ;;  %v4675_v5 = vadd.f32 %v4598_v37, %v1164_v48 }
 0x22d   : > { %6013 = vst [vmem:[#allocation26_spill] sm:$0xff] %v4647_v31  ;;  %6014 = vst [vmem:[#allocation27_spill] sm:$0xff] %v4650_v26  ;;  %v4678_v16 = vadd.f32 %v4598_v37, %v1167_v39  ;;  %v4681_v40 = vadd.f32 %v4598_v37, %v1170_v13  ;;  %v4684_v24 = vadd.f32 %v4598_v37, %v1173_v53 }
 0x22e   : > { %6015 = vst [vmem:[#allocation28_spill] sm:$0xff] %v4654_v58  ;;  %6016 = vst [vmem:[#allocation29_spill] sm:$0xff] %v4658_v30  ;;  %v4687_v3 = vadd.f32 %v4598_v37, %v1176_v25  ;;  %v4690_v56 = vadd.f32 %v4598_v37, %v1179_v61  ;;  %v4693_v45 = vadd.f32 %v4598_v37, %v1182_v44 }
 0x22f   : > { %6017 = vst [vmem:[#allocation30_spill] sm:$0xff] %v4664_v42  ;;  %6018 = vst [vmem:[#allocation31_spill] sm:$0xff] %v4675_v5  ;;  %v4696_v48 = vadd.f32 %v4598_v37, %v1185_v54  ;;  %v4699_v39 = vadd.f32 %v4598_v37, %v1188_v6  ;;  %v4702_v13 = vadd.f32 %v4598_v37, %v1191_v59  ;;  %v1203_v59 = vpop.xlane.xlu1 %1202 }
 0x230   : > { %6019 = vst [vmem:[#allocation32_spill] sm:$0xff] %v4678_v16  ;;  %6020 = vst [vmem:[#allocation33_spill] sm:$0xff] %v4690_v56  ;;  %v1449_v53 = vrot.slane %v4614_v4, %v4601_v7  ;;  %v1454_v25 = vrot.slane %v4618_v55, %v4604_v46  ;;  %v4709_v61 = vadd.f32 %v4598_v37, %v1194_v36 }
 0x231   : > { %6021 = vst [vmem:[#allocation34_spill] sm:$0xff] %v4699_v39  ;;  %v1461_v44 = vrot.slane %v4622_v21, %v4607_v19  ;;  %v1474_v54 = vrot.slane %v4630_v17, %v4601_v7  ;;  %v1478_v6 = vrot.slane %v4634_v41, %v4604_v46  ;;  %v4718_v29 = vadd.f32 %v4598_v37, %v1197_v9 }
 0x232   : > { %v1456_v4 = vsel %vm1455_vm3, %v1454_v25, %v1449_v53  ;;  %v1493_v55 = vrot.slane %v4647_v31, %v4601_v7  ;;  %v1497_v36 = vrot.slane %v4650_v26, %v4604_v46  ;;  %v4726_v21 = vadd.f32 %v4598_v37, %v1200_v32 }
 0x233   : > { %v4729_v17 = vadd.f32 %v4598_v37, %v1203_v59  ;;  %v1483_v41 = vrot.slane %v4638_v60, %v4607_v19  ;;  %v1502_v9 = vrot.slane %v4654_v58, %v4607_v19  ;;  %v1479_v53 = vsel %vm1455_vm3, %v1478_v6, %v1474_v54 }
 0x234   : > { %v1498_v25 = vsel %vm1455_vm3, %v1497_v36, %v1493_v55  ;;  %v1512_v26 = vrot.slane %v4661_v11, %v4601_v7  ;;  %v1516_v32 = vrot.slane %v4664_v42, %v4604_v46  ;;  %v4743_v59 = vadd.f32 %v4598_v37, %v4587_v10 }
 0x235   : > { %6022 = vst [vmem:[#allocation35_spill] sm:$0xff] %v4729_v17  ;;  %v4746_v31 = vadd.f32 %v4598_v37, %v1209_v15  ;;  %v1463_v58 = vsel %vm1462_vm4, %v1461_v44, %v1456_v4  ;;  %v1468_v54 = vrot.slane %v4626_v18, %v4610_v52  ;;  %v1488_v55 = vrot.slane %v4642_v33, %v4610_v52 }
 0x236   : > { %v1507_v6 = vrot.slane %v4658_v30, %v4610_v52  ;;  %v1531_v36 = vrot.slane %v4675_v5, %v4601_v7  ;;  %v1535_v10 = vrot.slane %v4678_v16, %v4604_v46  ;;  %v1484_v15 = vsel %vm1462_vm4, %v1483_v41, %v1479_v53 }
 0x237   : > { %v1503_v4 = vsel %vm1462_vm4, %v1502_v9, %v1498_v25  ;;  %v1521_v44 = vrot.slane %v4668_v14, %v4607_v19  ;;  %v1550_v42 = vrot.slane %v4687_v3, %v4601_v7  ;;  %v1470_v30 = vsel %vm1469_vm5, %v1468_v54, %v1463_v58 }
 0x238   : > { %v1517_v33 = vsel %vm1455_vm3, %v1516_v32, %v1512_v26  ;;  %v1540_v5 = vrot.slane %v4681_v40, %v4607_v19  ;;  %v1554_v16 = vrot.slane %v4690_v56, %v4604_v46  ;;  %v1536_v41 = vsel %vm1455_vm3, %v1535_v10, %v1531_v36 }
 0x239   : > { %v1559_v9 = vrot.slane %v4693_v45, %v4607_v19  ;;  %v1569_v53 = vrot.slane %v4699_v39, %v4601_v7  ;;  %v1573_v58 = vrot.slane %v4702_v13, %v4604_v46  ;;  %v1489_v26 = vsel %vm1469_vm5, %v1488_v55, %v1484_v15 }
 0x23a   : > { %v1508_v25 = vsel %vm1469_vm5, %v1507_v6, %v1503_v4  ;;  %v1555_v32 = vsel %vm1455_vm3, %v1554_v16, %v1550_v42  ;;  %v1578_v54 = vrot.slane %v4709_v61, %v4607_v19  ;;  %v1522_v36 = vsel %vm1462_vm4, %v1521_v44, %v1517_v33 }
 0x23b   : > { %v1574_v10 = vsel %vm1455_vm3, %v1573_v58, %v1569_v53  ;;  %v1588_v56 = vrot.slane %v4726_v21, %v4601_v7  ;;  %v1592_v39 = vrot.slane %v4729_v17, %v4604_v46  ;;  %v1526_v55 = vrot.slane %v4672_v28, %v4610_v52 }
 0x23c   : > { %v1541_v6 = vsel %vm1462_vm4, %v1540_v5, %v1536_v41  ;;  %v1545_v42 = vrot.slane %v4684_v24, %v4610_v52  ;;  %v1597_v16 = vrot.slane %v4743_v59, %v4607_v19  ;;  %v1560_v33 = vsel %vm1462_vm4, %v1559_v9, %v1555_v32 }
 0x23d   : > { %v1579_v15 = vsel %vm1462_vm4, %v1578_v54, %v1574_v10  ;;  %v1593_v4 = vsel %vm1455_vm3, %v1592_v39, %v1588_v56  ;;  %v1757_v44 = vsel %vm1756_vm6, %v1489_v26, %v1470_v30  ;;  %v1527_v53 = vsel %vm1469_vm5, %v1526_v55, %v1522_v36 }
 0x23e   : > { %v1564_v58 = vrot.slane %v4696_v48, %v4610_v52  ;;  %v1583_v5 = vrot.slane %v4718_v29, %v4610_v52  ;;  %v1759_v41 = vsel %vm1758_vm7, %v1508_v25, %v1757_v44  ;;  %v1546_v17 = vsel %vm1469_vm5, %v1545_v42, %v1541_v6  ;;  %v6034_v44 = vld [vmem:[#allocation9_spill] sm:$0xff] }
 0x23f   : > { %v1598_v9 = vsel %vm1462_vm4, %v1597_v16, %v1593_v4  ;;  %v1761_v32 = vsel %vm1760_vm8, %v1527_v53, %v1759_v41  ;;  %v1602_v39 = vrot.slane %v4746_v31, %v4610_v52  ;;  %v4817_v25 = vadd.f32 %v4598_v37, %v4521_v35  ;;  %v6032_v4 = vld [vmem:[#allocation13_spill] sm:$0xff]  ;;  %v6035_v53 = vld [vmem:[#allocation10_spill] sm:$0xff] }
 0x240   : > { %v1565_v56 = vsel %vm1469_vm5, %v1564_v58, %v1560_v33  ;;  %v1584_v30 = vsel %vm1469_vm5, %v1583_v5, %v1579_v15  ;;  %v1763_v26 = vsel %vm1762_vm9, %v1546_v17, %v1761_v32  ;;  %v4821_v36 = vadd.f32 %v4598_v37, %v4523_v49  ;;  %v6031_v15 = vld [vmem:[#allocation11_spill] sm:$0xff]  ;;  %v6036_v58 = vld [vmem:[#allocation14_spill] sm:$0xff] }
 0x241   : > { %v1765_v54 = vsel %vm1764_vm10, %v1565_v56, %v1763_v26  ;;  %v4825_v10 = vadd.f32 %v4598_v37, %v4511_v27  ;;  %v1603_v55 = vsel %vm1469_vm5, %v1602_v39, %v1598_v9  ;;  %v4831_v17 = vadd.f32 %v4598_v37, %v4519_v34  ;;  %v6038_v9 = vld [vmem:[#allocation17_spill] sm:$0xff]  ;;  %v6040_v26 = vld [vmem:[#allocation12_spill] sm:$0xff] }
 0x242   : > { %6023 = vst [vmem:[#allocation36_spill] sm:$0xff] %v4821_v36  ;;  %v1767_v6 = vsel %vm1766_vm11, %v1584_v30, %v1765_v54  ;;  %v4835_v35 = vadd.f32 %v4598_v37, %v4541_v50  ;;  %v4840_v49 = vadd.f32 %v4598_v37, %v4539_v1  ;;  %v4844_v27 = vadd.f32 %v4598_v37, %v4531_v63 }
 0x243   : > { %v1769_v42 = vsel %vm1768_vm12, %v1603_v55, %v1767_v6  ;;  %v4848_v16 = vadd.f32 %v4598_v37, %v4533_v0  ;;  %v4853_v50 = vadd.f32 %v4598_v37, %v4553_v51  ;;  %v4857_v33 = vadd.f32 %v4598_v37, %v4551_v22 }
 0x244   : > { %6024 = vst [vmem:[#allocation37_spill] sm:$0xff] %v4840_v49  ;;  %v1780_v34 = vsel %vm1779_vm13, %v1769_v42, -inf  ;;  %v4861_v1 = vadd.f32 %v4598_v37, %v4549_v2  ;;  %v4865_v63 = vadd.f32 %v4598_v37, %v4547_v8  ;;  %v4869_v0 = vadd.f32 %v4598_v37, %v4565_v23 }
 0x245   : > { %6025 = vst [vmem:[#allocation38_spill] sm:$0xff] %v4848_v16  ;;  %6026 = vst [vmem:[#allocation39_spill] sm:$0xff] %v4857_v33  ;;  %1781 = vmax.xlane.f32.xlu1 %v1780_v34  ;;  %v4873_v51 = vadd.f32 %v4598_v37, %v4563_v62  ;;  %v4877_v22 = vadd.f32 %v4598_v37, %v4559_v57  ;;  %v4881_v2 = vadd.f32 %v4598_v37, %v4561_v12  ;;  %v6041_v34 = vld [vmem:[#allocation15_spill] sm:$0xff] }
 0x246   : > { %6027 = vst [vmem:[#allocation40_spill] sm:$0xff] %v4865_v63  ;;  %v4885_v8 = vadd.f32 %v4598_v37, %v4571_v43  ;;  %v4889_v23 = vadd.f32 %v4598_v37, %v4573_v20  ;;  %v4893_v62 = vadd.f32 %v4598_v37, %v4567_v38  ;;  %v4897_v57 = vadd.f32 %v4598_v37, %v4569_v47 }
 0x247   : > { %6028 = vst [vmem:[#allocation41_spill] sm:$0xff] %v4873_v51  ;;  %v4901_v12 = vadd.f32 %v4598_v37, %v6031_v15  ;;  %v4905_v43 = vadd.f32 %v4598_v37, %v6032_v4  ;;  %v4909_v20 = vadd.f32 %v4598_v37, %v6034_v44  ;;  %v4913_v38 = vadd.f32 %v4598_v37, %v6035_v53  ;;  %v6042_v4 = vld [vmem:[#allocation18_spill] sm:$0xff] }
 0x248   : > { %6029 = vst [vmem:[#allocation42_spill] sm:$0xff] %v4885_v8  ;;  %6030 = vst [vmem:[#allocation43_spill] sm:$0xff] %v4889_v23  ;;  %v4917_v47 = vadd.f32 %v4598_v37, %v6036_v58  ;;  %v1607_v5 = vrot.slane %v4817_v25, %v4601_v7  ;;  %v1611_v41 = vrot.slane %v4821_v36, %v4604_v46 }
 0x249   : > { %6033 = vst [vmem:[#allocation11_spill] sm:$0xff] %v4905_v43  ;;  %v4925_v32 = vadd.f32 %v4598_v37, %v6038_v9  ;;  %v1616_v56 = vrot.slane %v4825_v10, %v4607_v19  ;;  %v1626_v30 = vrot.slane %v4835_v35, %v4601_v7  ;;  %v1630_v39 = vrot.slane %v4840_v49, %v4604_v46 }
 0x24a   : > { %6037 = vst [vmem:[#allocation13_spill] sm:$0xff] %v4917_v47  ;;  %v4935_v54 = vadd.f32 %v4598_v37, %v6040_v26  ;;  %v1612_v55 = vsel %vm1455_vm3, %v1611_v41, %v1607_v5  ;;  %v1645_v6 = vrot.slane %v4853_v50, %v4601_v7  ;;  %v1649_v42 = vrot.slane %v4857_v33, %v4604_v46  ;;  %v1299_v5 = vpop.xlane.xlu1 %1298  ;;  %v6043_v33 = vld [vmem:[#allocation16_spill] sm:$0xff] }
 0x24b   : > { %6039 = vst [vmem:[#allocation9_spill] sm:$0xff] %v4925_v32  ;;  %v4944_v15 = vadd.f32 %v4598_v37, %v6041_v34  ;;  %v4948_v44 = vadd.f32 %v4598_v37, %v6042_v4  ;;  %v1635_v53 = vrot.slane %v4844_v27, %v4607_v19  ;;  %v1654_v58 = vrot.slane %v4861_v1, %v4607_v19 }
 0x24c   : > { %v1631_v41 = vsel %vm1455_vm3, %v1630_v39, %v1626_v30  ;;  %v1650_v9 = vsel %vm1455_vm3, %v1649_v42, %v1645_v6  ;;  %v1664_v26 = vrot.slane %v4869_v0, %v4601_v7  ;;  %v1668_v34 = vrot.slane %v4873_v51, %v4604_v46 }
 0x24d   : > { %v4961_v4 = vadd.f32 %v4598_v37, %v1299_v5  ;;  %v4965_v49 = vadd.f32 %v4598_v37, %v6043_v33  ;;  %v1617_v36 = vsel %vm1462_vm4, %v1616_v56, %v1612_v55  ;;  %v1621_v30 = vrot.slane %v4831_v17, %v4610_v52 }
 0x24e   : > { %v1640_v39 = vrot.slane %v4848_v16, %v4610_v52  ;;  %v1659_v6 = vrot.slane %v4865_v63, %v4610_v52  ;;  %v1683_v42 = vrot.slane %v4885_v8, %v4601_v7  ;;  %v1687_v5 = vrot.slane %v4889_v23, %v4604_v46 }
 0x24f   : > { %v1636_v33 = vsel %vm1462_vm4, %v1635_v53, %v1631_v41  ;;  %v1655_v51 = vsel %vm1462_vm4, %v1654_v58, %v1650_v9  ;;  %v1673_v56 = vrot.slane %v4877_v22, %v4607_v19  ;;  %v1702_v55 = vrot.slane %v4901_v12, %v4601_v7 }
 0x250   : > { %v1622_v16 = vsel %vm1469_vm5, %v1621_v30, %v1617_v36  ;;  %v1669_v63 = vsel %vm1455_vm3, %v1668_v34, %v1664_v26  ;;  %v1692_v8 = vrot.slane %v4893_v62, %v4607_v19  ;;  %v1706_v23 = vrot.slane %v4905_v43, %v4604_v46 }
 0x251   : > { %v1688_v53 = vsel %vm1455_vm3, %v1687_v5, %v1683_v42  ;;  %v1711_v58 = vrot.slane %v4909_v20, %v4607_v19  ;;  %v1721_v41 = vrot.slane %v4917_v47, %v4601_v7  ;;  %v1725_v9 = vrot.slane %v4925_v32, %v4604_v46  ;;  %v6044_v32 = vld [vmem:[#allocation25_spill] sm:$0xff] }
 0x252   : > { %v1641_v36 = vsel %vm1469_vm5, %v1640_v39, %v1636_v33  ;;  %v1660_v26 = vsel %vm1469_vm5, %v1659_v6, %v1655_v51  ;;  %v1707_v34 = vsel %vm1455_vm3, %v1706_v23, %v1702_v55  ;;  %v1730_v30 = vrot.slane %v4935_v54, %v4607_v19 }
 0x253   : > { %v1674_v42 = vsel %vm1462_vm4, %v1673_v56, %v1669_v63  ;;  %v1726_v5 = vsel %vm1455_vm3, %v1725_v9, %v1721_v41  ;;  %v1740_v43 = vrot.slane %v4948_v44, %v4601_v7  ;;  %v1744_v47 = vrot.slane %v4961_v4, %v4604_v46 }
 0x254   : > { %v5010_v39 = vadd.f32 %v4598_v37, %v6044_v32  ;;  %v1678_v51 = vrot.slane %v4881_v2, %v4610_v52  ;;  %v1693_v23 = vsel %vm1462_vm4, %v1692_v8, %v1688_v53  ;;  %v1749_v63 = vrot.slane %v4965_v49, %v4607_v19 }
 0x255   : > { %v1697_v6 = vrot.slane %v4897_v57, %v4610_v52  ;;  %v1712_v33 = vsel %vm1462_vm4, %v1711_v58, %v1707_v34  ;;  %v1745_v56 = vsel %vm1455_vm3, %v1744_v47, %v1740_v43  ;;  %v1770_v55 = vsel %vm1756_vm6, %v1641_v36, %v1622_v16 }
 0x256   : > { %v1679_v37 = vsel %vm1469_vm5, %v1678_v51, %v1674_v42  ;;  %v1716_v32 = vrot.slane %v4913_v38, %v4610_v52  ;;  %v1731_v41 = vsel %vm1462_vm4, %v1730_v30, %v1726_v5  ;;  %v1771_v8 = vsel %vm1758_vm7, %v1660_v26, %v1770_v55 }
 0x257   : > { %v1698_v53 = vsel %vm1469_vm5, %v1697_v6, %v1693_v23  ;;  %v1735_v9 = vrot.slane %v4944_v15, %v4610_v52  ;;  %v1750_v58 = vsel %vm1462_vm4, %v1749_v63, %v1745_v56  ;;  %v1772_v43 = vsel %vm1760_vm8, %v1679_v37, %v1771_v8  ;;  %v6045_v23 = vld [vmem:[#allocation7_spill] sm:$0xff]  ;;  %v6046_v56 = vld [vmem:[#allocation8_spill] sm:$0xff] }
 0x258   : > { %v1717_v16 = vsel %vm1469_vm5, %v1716_v32, %v1712_v33  ;;  %v1754_v47 = vrot.slane %v5010_v39, %v4610_v52  ;;  %v1773_v36 = vsel %vm1762_vm9, %v1698_v53, %v1772_v43  ;;  %v5043_v63 = vsub.s32 1, %v6045_v23  ;;  %v6047_v8 = vld [vmem:[#allocation19_spill] sm:$0xff]  ;;  %v6048_v43 = vld [vmem:[#allocation26_spill] sm:$0xff] }
 0x259   : > { %v1736_v34 = vsel %vm1469_vm5, %v1735_v9, %v1731_v41  ;;  %v1774_v26 = vsel %vm1764_vm10, %v1717_v16, %v1773_v36  ;;  %v5046_v6 = vsub.s32 2, %v6045_v23  ;;  %v5061_v9 = vsub.s32 3, %v6045_v23  ;;  %v6049_v36 = vld [vmem:[#allocation20_spill] sm:$0xff] }
 0x25a   : > { %v1755_v30 = vsel %vm1469_vm5, %v1754_v47, %v1750_v58  ;;  %v1775_v42 = vsel %vm1766_vm11, %v1736_v34, %v1774_v26 }
 0x25b   : > { %v1776_v5 = vsel %vm1768_vm12, %v1755_v30, %v1775_v42 }
 0x25c   : > { %v1783_v51 = vsel %vm1779_vm13, %v1776_v5, -inf }
 0x25d   : > { %1784 = vmax.xlane.f32.xlu1 %v1783_v51  ;;  %v6051_v51 = vld [vmem:[#allocation21_spill] sm:$0xff] }
 0x2d2   : > { %v5048_v33 = vpop.xlane.xlu1 %1781 }
 0x2d3   : > { %v1791_v55 = vrot.slane %v5048_v33, %v6046_v56  ;;  %v1795_v37 = vrot.slane %v5048_v33, %v5043_v63  ;;  %v5056_v32 = vrot.slane %v5048_v33, %v5046_v6  ;;  %v5068_v26 = vrot.slane %v5048_v33, %v5061_v9 }
 0x2d5   : > { %v1874_v41 = vsub.f32 %v4638_v60, %v1795_v37  ;;  %v1868_v53 = vsub.f32 %v6047_v8, %v1791_v55  ;;  %v1876_v16 = vsub.f32 %v6048_v43, %v5056_v32  ;;  %v1869_v34 = vsub.f32 %v6049_v36, %v1791_v55  ;;  %v6050_v60 = vld [vmem:[#allocation28_spill] sm:$0xff] }
 0x2d6   : > { %v1878_v42 = vsub.f32 %v6050_v60, %v5056_v32  ;;  %v1870_v8 = vsub.f32 %v6051_v51, %v1791_v55  ;;  %v1871_v36 = vsub.f32 %v4626_v18, %v1791_v55  ;;  %v1882_v60 = vsub.f32 %v4668_v14, %v5068_v26  ;;  %v6054_v55 = vld [vmem:[#allocation31_spill] sm:$0xff] }
 0x2d7   : > { %v1944_v58 = vmul.f32 1.442695, %v1874_v41  ;;  %v1932_v47 = vmul.f32 1.442695, %v1868_v53  ;;  %v1948_v30 = vmul.f32 1.442695, %v1876_v16  ;;  %v1880_v53 = vsub.f32 %v4661_v11, %v5068_v26 }
 0x2d8   : > { %v1934_v5 = vmul.f32 1.442695, %v1869_v34  ;;  %v5074_v41 = vsub.s32 4, %v6045_v23  ;;  %v1936_v43 = vmul.f32 1.442695, %v1870_v8  ;;  %v6053_v11 = vld [vmem:[#allocation22_spill] sm:$0xff] }
 0x2d9   : > { %3660 = vpow2.f32 %v1944_v58  ;;  %v1952_v58 = vmul.f32 1.442695, %v1878_v42  ;;  %v1956_v34 = vmul.f32 1.442695, %v1880_v53  ;;  %v1872_v42 = vsub.f32 %v6053_v11, %v1795_v37  ;;  %v6056_v53 = vld [vmem:[#allocation23_spill] sm:$0xff] }
 0x2da   : > { %3662 = vpow2.f32 %v1932_v47  ;;  %v5083_v47 = vrot.slane %v5048_v33, %v5074_v41  ;;  %v1960_v18 = vmul.f32 1.442695, %v1882_v60 }
 0x2db   : > { %3664 = vpow2.f32 %v1948_v30  ;;  %v1938_v30 = vmul.f32 1.442695, %v1871_v36  ;;  %v1940_v14 = vmul.f32 1.442695, %v1872_v42  ;;  %v6058_v42 = vld [vmem:[#allocation24_spill] sm:$0xff] }
 0x2dc   : > { %3666 = vpow2.f32 %v1934_v5  ;;  %v5090_v5 = vsub.s32 5, %v6045_v23  ;;  %v1884_v51 = vsub.f32 %v6054_v55, %v5083_v47  ;;  %v1886_v60 = vsub.f32 %v4681_v40, %v5083_v47 }
 0x2dd   : > { %3668 = vpow2.f32 %v1952_v58 }
 0x2de   : > { %3670 = vpow2.f32 %v1936_v43  ;;  %v1873_v43 = vsub.f32 %v6056_v53, %v1795_v37  ;;  %v5103_v36 = vrot.slane %v5048_v33, %v5090_v5  ;;  %v1875_v53 = vsub.f32 %v6058_v42, %v1795_v37 }
 0x2df   : > { %3672 = vpow2.f32 %v1956_v34  ;;  %v1964_v34 = vmul.f32 1.442695, %v1884_v51  ;;  %v5147_v42 = vsub.s32 6, %v6045_v23 }
 0x2e0   : > { %3674 = vpow2.f32 %v1938_v30  ;;  %v1942_v30 = vmul.f32 1.442695, %v1873_v43 }
 0x2e1   : > { %3676 = vpow2.f32 %v1960_v18  ;;  %v1888_v18 = vsub.f32 %v4687_v3, %v5103_v36 }
 0x2e2   : > { %3678 = vpow2.f32 %v1940_v14 }
 0x2e3   : > { %v5079_v16 = vpop.eup %3660  ;;  %3680 = vpow2.f32 %v1964_v34  ;;  %v1972_v14 = vmul.f32 1.442695, %v1888_v18 }
 0x2e4   : > { %6052 = vst [vmem:[#allocation10_spill] sm:$0xff] %v5079_v16  ;;  %2143 = vperm.xlu0 %3656, %v5079_v16   ;;  %v5094_v8 = vpop.eup %3662  ;;  %3682 = vpow2.f32 %v1942_v30  ;;  %v1946_v16 = vmul.f32 1.442695, %v1875_v53  ;;  %v6069_v53 = vld [vmem:[#allocation27_spill] sm:$0xff] }
 0x2e5   : > { %v5096_v58 = vpop.eup %3664  ;;  %2125 = vperm.xlu1 %3657, %v5094_v8   ;;  %v1877_v18 = vsub.f32 %v6069_v53, %v5056_v32 }
 0x2e6   : > { %6055 = vst [vmem:[#allocation14_spill] sm:$0xff] %v5096_v58  ;;  %v5107_v11 = vpop.eup %3666 }
 0x2e7   : > { %v5109_v55 = vpop.eup %3668 }
 0x2e8   : > { %2149 = vperm.xlu0 %3656, %v5096_v58   ;;  %6057 = vst [vmem:[#allocation17_spill] sm:$0xff] %v5109_v55  ;;  %v1968_v58 = vmul.f32 1.442695, %v1886_v60  ;;  %v5116_v51 = vpop.eup %3670 }
 0x2e9   : > { %2128 = vperm.xlu1 %3657, %v5107_v11   ;;  %6059 = vst [vmem:[#allocation12_spill] sm:$0xff] %v5116_v51  ;;  %v5118_v40 = vpop.eup %3672 }
 0x2ea   : > { %6060 = vst [vmem:[#allocation15_spill] sm:$0xff] %v5118_v40  ;;  %3684 = vpow2.f32 %v1968_v58  ;;  %v5122_v43 = vpop.eup %3674 }
 0x2eb   : > { %6061 = vst [vmem:[#allocation18_spill] sm:$0xff] %v5122_v43  ;;  %v5124_v37 = vpop.eup %3676  ;;  %3686 = vpow2.f32 %v1946_v16 }
 0x2ec   : > { %2155 = vperm.xlu0 %3656, %v5109_v55   ;;  %6062 = vst [vmem:[#allocation16_spill] sm:$0xff] %v5124_v37  ;;  %3688 = vpow2.f32 %v1972_v14  ;;  %v5128_v3 = vpop.eup %3678  ;;  %v5153_v14 = vrot.slane %v5048_v33, %v5147_v42  ;;  %v5160_v55 = vsub.s32 7, %v6045_v23 }
 0x2ed   : > { %2131 = vperm.xlu1 %3657, %v5116_v51   ;;  %6063 = vst [vmem:[#allocation25_spill] sm:$0xff] %v5128_v3  ;;  %v5130_v34 = vpop.eup %3680 }
 0x2ee   : > { %6064 = vst [vmem:[#allocation7_spill] sm:$0xff] %v5130_v34  ;;  %v5134_v58 = vpop.eup %3682  ;;  %v5168_v51 = vrot.slane %v5048_v33, %v5160_v55 }
 0x2ef   : > { %6065 = vst [vmem:[#allocation8_spill] sm:$0xff] %v5134_v58 }
 0x2f0   : > { %2161 = vperm.xlu0 %3656, %v5118_v40  }
 0x2f1   : > { %2134 = vperm.xlu1 %3657, %v5122_v43  }
 0x2f4   : > { %2167 = vperm.xlu0 %3656, %v5124_v37   ;;  %v5136_v60 = vpop.eup %3684  ;;  %v6070_v37 = vld [vmem:[#allocation29_spill] sm:$0xff] }
 0x2f5   : > { %2137 = vperm.xlu1 %3657, %v5128_v3   ;;  %6066 = vst [vmem:[#allocation19_spill] sm:$0xff] %v5136_v60  ;;  %v5140_v30 = vpop.eup %3686  ;;  %v1879_v40 = vsub.f32 %v6070_v37, %v5056_v32  ;;  %v6072_v3 = vld [vmem:[#allocation30_spill] sm:$0xff]  ;;  %v1894_v32 = vsub.f32 %v4709_v61, %v5153_v14  ;;  %v1883_v37 = vsub.f32 %v4672_v28, %v5068_v26 }
 0x2f6   : > { %6067 = vst [vmem:[#allocation26_spill] sm:$0xff] %v5140_v30  ;;  %v5142_v16 = vpop.eup %3688  ;;  %v1881_v43 = vsub.f32 %v6072_v3, %v5068_v26  ;;  %v5176_v3 = vpop.xlane.xlu1 %1784  ;;  %v1898_v28 = vsub.f32 %v4743_v59, %v5168_v51 }
 0x2f7   : > { %6068 = vst [vmem:[#allocation20_spill] sm:$0xff] %v5142_v16  ;;  %v1954_v53 = vmul.f32 1.442695, %v1879_v40  ;;  %v1896_v40 = vsub.f32 %v4726_v21, %v5168_v51  ;;  %v1962_v33 = vmul.f32 1.442695, %v1883_v37  ;;  %v5182_v61 = vrot.slane %v5176_v3, %v6046_v56 }
 0x2f8   : > { %2173 = vperm.xlu0 %3656, %v5130_v34   ;;  %v1950_v34 = vmul.f32 1.442695, %v1877_v18  ;;  %v1958_v23 = vmul.f32 1.442695, %v1881_v43  ;;  %v1992_v18 = vmul.f32 1.442695, %v1898_v28 }
 0x2f9   : > { %2140 = vperm.xlu1 %3657, %v5134_v58   ;;  %v1988_v43 = vmul.f32 1.442695, %v1896_v40 }
 0x2fa   : > { %3690 = vpow2.f32 %v1950_v34  ;;  %v1984_v34 = vmul.f32 1.442695, %v1894_v32 }
 0x2fc   : > { %2179 = vperm.xlu0 %3656, %v5136_v60   ;;  %v1890_v60 = vsub.f32 %v4693_v45, %v5103_v36 }
 0x2fd   : > { %2146 = vperm.xlu1 %3657, %v5140_v30   ;;  %v6071_v30 = vld [vmem:[#allocation34_spill] sm:$0xff] }
 0x2fe   : > { %v1892_v58 = vsub.f32 %v6071_v30, %v5153_v14 }
 0x300   : > { %2185 = vperm.xlu0 %3656, %v5142_v16   ;;  %v1976_v16 = vmul.f32 1.442695, %v1890_v60  ;;  %v1980_v45 = vmul.f32 1.442695, %v1892_v58  ;;  %v6073_v60 = vld [vmem:[#allocation32_spill] sm:$0xff] }
 0x301   : > { %v1885_v58 = vsub.f32 %v6073_v60, %v5083_v47  ;;  %v1891_v60 = vsub.f32 %v4696_v48, %v5103_v36  ;;  %v5230_v48 = vrot.slane %v5176_v3, %v5046_v6 }
 0x302   : > { %3692 = vpow2.f32 %v1976_v16  ;;  %v1887_v16 = vsub.f32 %v4684_v24, %v5083_v47  ;;  %v5206_v24 = vrot.slane %v5176_v3, %v5043_v63 }
 0x303   : > { %3694 = vpow2.f32 %v1954_v53  ;;  %v1966_v21 = vmul.f32 1.442695, %v1885_v58  ;;  %v1900_v53 = vsub.f32 %v4817_v25, %v5182_v61  ;;  %v1902_v25 = vsub.f32 %v4825_v10, %v5182_v61 }
 0x304   : > { %3696 = vpow2.f32 %v1980_v45  ;;  %v5186_v26 = vpop.eup %3690  ;;  %v1970_v32 = vmul.f32 1.442695, %v1887_v16  ;;  %v1978_v16 = vmul.f32 1.442695, %v1891_v60 }
 0x305   : > { %3698 = vpow2.f32 %v1958_v23  ;;  %2152 = vperm.xlu1 %3657, %v5186_v26   ;;  %v6075_v23 = vld [vmem:[#allocation33_spill] sm:$0xff]  ;;  %v1996_v47 = vmul.f32 1.442695, %v1900_v53  ;;  %v2000_v58 = vmul.f32 1.442695, %v1902_v25  ;;  %v6080_v25 = vld [vmem:[#allocation35_spill] sm:$0xff] }
 0x306   : > { %3700 = vpow2.f32 %v1984_v34  ;;  %v1889_v37 = vsub.f32 %v6075_v23, %v5103_v36  ;;  %v1908_v23 = vsub.f32 %v4853_v50, %v5230_v48  ;;  %v1910_v50 = vsub.f32 %v4861_v1, %v5230_v48 }
 0x307   : > { %3702 = vpow2.f32 %v1962_v33 }
 0x308   : > { %3704 = vpow2.f32 %v1988_v43  ;;  %v1974_v33 = vmul.f32 1.442695, %v1889_v37  ;;  %v1904_v43 = vsub.f32 %v4835_v35, %v5206_v24  ;;  %v1906_v35 = vsub.f32 %v4844_v27, %v5206_v24 }
 0x309   : > { %3706 = vpow2.f32 %v1966_v21  ;;  %v1893_v21 = vsub.f32 %v4702_v13, %v5153_v14  ;;  %v1895_v13 = vsub.f32 %v4718_v29, %v5153_v14  ;;  %v5254_v14 = vrot.slane %v5176_v3, %v5061_v9 }
 0x30a   : > { %3708 = vpow2.f32 %v1992_v18  ;;  %v2004_v36 = vmul.f32 1.442695, %v1904_v43  ;;  %v2008_v37 = vmul.f32 1.442695, %v1906_v35  ;;  %v2012_v60 = vmul.f32 1.442695, %v1908_v23 }
 0x30b   : > { %3710 = vpow2.f32 %v1970_v32  ;;  %v1982_v32 = vmul.f32 1.442695, %v1893_v21  ;;  %v1986_v29 = vmul.f32 1.442695, %v1895_v13  ;;  %v1899_v21 = vsub.f32 %v4746_v31, %v5168_v51  ;;  %v6083_v23 = vld [vmem:[#allocation36_spill] sm:$0xff] }
 0x30c   : > { %v5188_v30 = vpop.eup %3692  ;;  %3712 = vpow2.f32 %v1996_v47  ;;  %v1912_v35 = vsub.f32 %v4869_v0, %v5254_v14  ;;  %v2016_v1 = vmul.f32 1.442695, %v1910_v50  ;;  %v1901_v31 = vsub.f32 %v6083_v23, %v5182_v61 }
 0x30d   : > { %2191 = vperm.xlu0 %3656, %v5188_v30   ;;  %v5196_v45 = vpop.eup %3694  ;;  %3714 = vpow2.f32 %v1974_v33  ;;  %v1897_v33 = vsub.f32 %v6080_v25, %v5168_v51  ;;  %v5278_v51 = vrot.slane %v5176_v3, %v5074_v41  ;;  %v1914_v0 = vsub.f32 %v4877_v22, %v5254_v14 }
 0x30e   : > { %v5198_v59 = vpop.eup %3696  ;;  %2158 = vperm.xlu1 %3657, %v5196_v45   ;;  %3716 = vpow2.f32 %v2000_v58  ;;  %v1998_v50 = vmul.f32 1.442695, %v1901_v31 }
 0x30f   : > { %6074 = vst [vmem:[#allocation28_spill] sm:$0xff] %v5198_v59  ;;  %v5210_v34 = vpop.eup %3698  ;;  %3718 = vpow2.f32 %v1978_v16  ;;  %v1990_v16 = vmul.f32 1.442695, %v1897_v33  ;;  %v2024_v22 = vmul.f32 1.442695, %v1914_v0 }
 0x310   : > { %v5212_v40 = vpop.eup %3700  ;;  %3720 = vpow2.f32 %v2004_v36 }
 0x311   : > { %2197 = vperm.xlu0 %3656, %v5198_v59   ;;  %6076 = vst [vmem:[#allocation21_spill] sm:$0xff] %v5212_v40  ;;  %v5220_v28 = vpop.eup %3702  ;;  %3722 = vpow2.f32 %v1982_v32  ;;  %v1994_v32 = vmul.f32 1.442695, %v1899_v21 }
 0x312   : > { %2164 = vperm.xlu1 %3657, %v5210_v34   ;;  %v5222_v10 = vpop.eup %3704  ;;  %3724 = vpow2.f32 %v2008_v37  ;;  %v2020_v37 = vmul.f32 1.442695, %v1912_v35 }
 0x313   : > { %6077 = vst [vmem:[#allocation22_spill] sm:$0xff] %v5222_v10  ;;  %v5234_v18 = vpop.eup %3706  ;;  %3726 = vpow2.f32 %v1986_v29  ;;  %v1903_v29 = vsub.f32 %v4831_v17, %v5182_v61  ;;  %v5302_v17 = vrot.slane %v5176_v3, %v5090_v5  ;;  %v1918_v61 = vsub.f32 %v4893_v62, %v5278_v51 }
 0x314   : > { %v5236_v53 = vpop.eup %3708  ;;  %3728 = vpow2.f32 %v2012_v60  ;;  %v6086_v60 = vld [vmem:[#allocation42_spill] sm:$0xff] }
 0x315   : > { %2203 = vperm.xlu0 %3656, %v5212_v40   ;;  %6078 = vst [vmem:[#allocation31_spill] sm:$0xff] %v5236_v53  ;;  %v5244_v27 = vpop.eup %3710  ;;  %3730 = vpow2.f32 %v1990_v16  ;;  %v1916_v21 = vsub.f32 %v6086_v60, %v5278_v51  ;;  %v2002_v23 = vmul.f32 1.442695, %v1903_v29  ;;  %v2032_v62 = vmul.f32 1.442695, %v1918_v61 }
 0x316   : > { %2170 = vperm.xlu1 %3657, %v5220_v28   ;;  %v5246_v47 = vpop.eup %3712  ;;  %3732 = vpow2.f32 %v2016_v1  ;;  %v6089_v1 = vld [vmem:[#allocation37_spill] sm:$0xff] }
 0x317   : > { %6079 = vst [vmem:[#allocation23_spill] sm:$0xff] %v5246_v47  ;;  %v5258_v58 = vpop.eup %3714  ;;  %3734 = vpow2.f32 %v1994_v32  ;;  %v1905_v32 = vsub.f32 %v6089_v1, %v5206_v24  ;;  %v2028_v31 = vmul.f32 1.442695, %v1916_v21  ;;  %v1920_v1 = vsub.f32 %v4901_v12, %v5302_v17 }
 0x318   : > { %v5260_v43 = vpop.eup %3716  ;;  %3736 = vpow2.f32 %v2020_v37  ;;  %v1922_v12 = vsub.f32 %v4909_v20, %v5302_v17 }
 0x319   : > { %2209 = vperm.xlu0 %3656, %v5222_v10   ;;  %6081 = vst [vmem:[#allocation24_spill] sm:$0xff] %v5260_v43  ;;  %v5268_v36 = vpop.eup %3718  ;;  %3738 = vpow2.f32 %v1998_v50  ;;  %v6092_v50 = vld [vmem:[#allocation38_spill] sm:$0xff]  ;;  %v2006_v60 = vmul.f32 1.442695, %v1905_v32  ;;  %v5326_v32 = vrot.slane %v5176_v3, %v5147_v42 }
 0x31a   : > { %2176 = vperm.xlu1 %3657, %v5234_v18   ;;  %v5270_v13 = vpop.eup %3720  ;;  %3740 = vpow2.f32 %v2024_v22  ;;  %v1907_v29 = vsub.f32 %v6092_v50, %v5206_v24  ;;  %v2040_v20 = vmul.f32 1.442695, %v1922_v12 }
 0x31b   : > { %6082 = vst [vmem:[#allocation27_spill] sm:$0xff] %v5270_v13  ;;  %v5282_v25 = vpop.eup %3722  ;;  %3742 = vpow2.f32 %v2002_v23  ;;  %v2036_v23 = vmul.f32 1.442695, %v1920_v1 }
 0x31c   : > { %6084 = vst [vmem:[#allocation29_spill] sm:$0xff] %v5282_v25  ;;  %v5284_v33 = vpop.eup %3724  ;;  %3744 = vpow2.f32 %v2028_v31  ;;  %v2010_v24 = vmul.f32 1.442695, %v1907_v29 }
 0x31d   : > { %2215 = vperm.xlu0 %3656, %v5236_v53   ;;  %6085 = vst [vmem:[#allocation34_spill] sm:$0xff] %v5284_v33  ;;  %v5292_v16 = vpop.eup %3726  ;;  %3746 = vpow2.f32 %v2006_v60  ;;  %v6099_v60 = vld [vmem:[#allocation13_spill] sm:$0xff] }
 0x31e   : > { %2182 = vperm.xlu1 %3657, %v5244_v27   ;;  %6087 = vst [vmem:[#allocation30_spill] sm:$0xff] %v5292_v16  ;;  %v5294_v35 = vpop.eup %3728  ;;  %3748 = vpow2.f32 %v2032_v62 }
 0x31f   : > { %6088 = vst [vmem:[#allocation32_spill] sm:$0xff] %v5294_v35  ;;  %v5306_v0 = vpop.eup %3730  ;;  %3750 = vpow2.f32 %v2010_v24  ;;  %v1926_v24 = vsub.f32 %v4935_v54, %v5326_v32 }
 0x320   : > { %6090 = vst [vmem:[#allocation33_spill] sm:$0xff] %v5306_v0  ;;  %v5308_v37 = vpop.eup %3732  ;;  %3752 = vpow2.f32 %v2036_v23 }
 0x321   : > { %2221 = vperm.xlu0 %3656, %v5246_v47   ;;  %6091 = vst [vmem:[#allocation35_spill] sm:$0xff] %v5308_v37  ;;  %v5316_v22 = vpop.eup %3734  ;;  %v2048_v54 = vmul.f32 1.442695, %v1926_v24  ;;  %v1919_v24 = vsub.f32 %v4897_v57, %v5278_v51 }
 0x322   : > { %2188 = vperm.xlu1 %3657, %v5258_v58   ;;  %6093 = vst [vmem:[#allocation36_spill] sm:$0xff] %v5316_v22  ;;  %v5318_v21 = vpop.eup %3736 }
 0x323   : > { %6094 = vst [vmem:[#allocation42_spill] sm:$0xff] %v5318_v21  ;;  %v5330_v61 = vpop.eup %3738 }
 0x324   : > { %6096 = vst [vmem:[#allocation37_spill] sm:$0xff] %v5330_v61  ;;  %v5332_v31 = vpop.eup %3740 }
 0x325   : > { %2227 = vperm.xlu0 %3656, %v5260_v43   ;;  %6097 = vst [vmem:[#allocation38_spill] sm:$0xff] %v5332_v31  ;;  %v5340_v62 = vpop.eup %3742 }
 0x326   : > { %2194 = vperm.xlu1 %3657, %v5268_v36   ;;  %v5342_v1 = vpop.eup %3744 }
 0x327   : > { %v5354_v23 = vpop.eup %3746 }
 0x328   : > { %6103 = vst [vmem:[#allocation13_spill] sm:$0xff] %v5354_v23 }
 0x329   : > { %2233 = vperm.xlu0 %3656, %v5270_v13  }
 0x32a   : > { %2200 = vperm.xlu1 %3657, %v5282_v25  }
 0x32d   : > { %2239 = vperm.xlu0 %3656, %v5284_v33  }
 0x32e   : > { %2206 = vperm.xlu1 %3657, %v5292_v16  }
 0x331   : > { %2245 = vperm.xlu0 %3656, %v5294_v35   ;;  %v6095_v35 = vld [vmem:[#allocation39_spill] sm:$0xff] }
 0x332   : > { %2212 = vperm.xlu1 %3657, %v5306_v0   ;;  %v1909_v33 = vsub.f32 %v6095_v35, %v5230_v48  ;;  %v6098_v35 = vld [vmem:[#allocation40_spill] sm:$0xff]  ;;  %6100 = vst [vmem:[#allocation39_spill] sm:$0xff] %v5340_v62 }
 0x333   : > { %v1911_v50 = vsub.f32 %v6098_v35, %v5230_v48  ;;  %6101 = vst [vmem:[#allocation40_spill] sm:$0xff] %v5342_v1  ;;  %v5356_v35 = vpop.eup %3748 }
 0x334   : > { %v2014_v29 = vmul.f32 1.442695, %v1909_v33  ;;  %v5350_v33 = vrot.slane %v5176_v3, %v5160_v55 }
 0x335   : > { %2251 = vperm.xlu0 %3656, %v5308_v37   ;;  %v6102_v37 = vld [vmem:[#allocation41_spill] sm:$0xff]  ;;  %v2018_v48 = vmul.f32 1.442695, %v1911_v50 }
 0x336   : > { %2218 = vperm.xlu1 %3657, %v5316_v22   ;;  %v1913_v13 = vsub.f32 %v6102_v37, %v5254_v14  ;;  %3754 = vpow2.f32 %v2014_v29  ;;  %6104 = vst [vmem:[#allocation41_spill] sm:$0xff] %v5356_v35  ;;  %v1915_v37 = vsub.f32 %v4881_v2, %v5254_v14  ;;  %v1928_v3 = vsub.f32 %v4948_v44, %v5350_v33  ;;  %v5364_v29 = vpop.eup %3750 }
 0x337   : > { %3756 = vpow2.f32 %v2040_v20  ;;  %6105 = vst [vmem:[#allocation44_spill] sm:$0xff] %v5364_v29  ;;  %v1930_v14 = vsub.f32 %v4965_v49, %v5350_v33 }
 0x338   : > { %3758 = vpow2.f32 %v2018_v48  ;;  %v2022_v50 = vmul.f32 1.442695, %v1913_v13  ;;  %v2026_v2 = vmul.f32 1.442695, %v1915_v37  ;;  %v2052_v44 = vmul.f32 1.442695, %v1928_v3 }
 0x339   : > { %2257 = vperm.xlu0 %3656, %v5318_v21   ;;  %v1924_v21 = vsub.f32 %v6099_v60, %v5326_v32  ;;  %v6107_v60 = vld [vmem:[#allocation43_spill] sm:$0xff]  ;;  %v2056_v37 = vmul.f32 1.442695, %v1930_v14 }
 0x33a   : > { %2224 = vperm.xlu1 %3657, %v5330_v61   ;;  %v1917_v20 = vsub.f32 %v6107_v60, %v5278_v51  ;;  %v6112_v3 = vld [vmem:[#allocation11_spill] sm:$0xff]  ;;  %v2034_v60 = vmul.f32 1.442695, %v1919_v24  ;;  %v6117_v24 = vld [vmem:[#allocation9_spill] sm:$0xff] }
 0x33b   : > { %v2044_v12 = vmul.f32 1.442695, %v1924_v21  ;;  %v5366_v21 = vpop.eup %3752 }
 0x33c   : > { %6106 = vst [vmem:[#allocation45_spill] sm:$0xff] %v5366_v21 }
 0x33d   : > { %2263 = vperm.xlu0 %3656, %v5332_v31   ;;  %3760 = vpow2.f32 %v2044_v12  ;;  %v2030_v12 = vmul.f32 1.442695, %v1917_v20  ;;  %v1923_v20 = vsub.f32 %v4913_v38, %v5302_v17 }
 0x33e   : > { %2230 = vperm.xlu1 %3657, %v5340_v62   ;;  %3762 = vpow2.f32 %v2022_v50 }
 0x33f   : > { %3764 = vpow2.f32 %v2048_v54  ;;  %v1921_v54 = vsub.f32 %v6112_v3, %v5302_v17 }
 0x340   : > { %v5374_v13 = vpop.eup %3754  ;;  %3766 = vpow2.f32 %v2026_v2 }
 0x341   : > { %2269 = vperm.xlu0 %3656, %v5342_v1   ;;  %6108 = vst [vmem:[#allocation43_spill] sm:$0xff] %v5374_v13  ;;  %v5376_v48 = vpop.eup %3756  ;;  %3768 = vpow2.f32 %v2052_v44  ;;  %v2038_v2 = vmul.f32 1.442695, %v1921_v54  ;;  %v1927_v54 = vsub.f32 %v4944_v15, %v5326_v32  ;;  %v1931_v15 = vsub.f32 %v5010_v39, %v5350_v33 }
 0x342   : > { %2236 = vperm.xlu1 %3657, %v5354_v23   ;;  %6109 = vst [vmem:[#allocation46_spill] sm:$0xff] %v5376_v48  ;;  %v5382_v50 = vpop.eup %3758  ;;  %3770 = vpow2.f32 %v2030_v12  ;;  %v1925_v12 = vsub.f32 %v6117_v24, %v5326_v32 }
 0x343   : > { %6110 = vst [vmem:[#allocation47_spill] sm:$0xff] %v5382_v50  ;;  %3772 = vpow2.f32 %v2056_v37  ;;  %v2042_v37 = vmul.f32 1.442695, %v1923_v20  ;;  %v1929_v20 = vsub.f32 %v4961_v4, %v5350_v33 }
 0x344   : > { %3774 = vpow2.f32 %v2034_v60  ;;  %v2046_v60 = vmul.f32 1.442695, %v1925_v12 }
 0x345   : > { %2275 = vperm.xlu0 %3656, %v5356_v35   ;;  %3776 = vpow2.f32 %v2038_v2  ;;  %v2050_v2 = vmul.f32 1.442695, %v1927_v54  ;;  %v2054_v32 = vmul.f32 1.442695, %v1929_v20  ;;  %v2058_v54 = vmul.f32 1.442695, %v1931_v15 }
 0x346   : > { %2242 = vperm.xlu1 %3657, %v5364_v29   ;;  %3778 = vpow2.f32 %v2042_v37 }
 0x347   : > { %v5384_v49 = vpop.eup %3760  ;;  %3780 = vpow2.f32 %v2046_v60 }
 0x348   : > { %6111 = vst [vmem:[#allocation48_spill] sm:$0xff] %v5384_v49  ;;  %v5390_v57 = vpop.eup %3762  ;;  %3782 = vpow2.f32 %v2050_v2 }
 0x349   : > { %2281 = vperm.xlu0 %3656, %v5366_v21   ;;  %6113 = vst [vmem:[#allocation11_spill] sm:$0xff] %v5390_v57  ;;  %v5392_v51 = vpop.eup %3764  ;;  %3784 = vpow2.f32 %v2054_v32 }
 0x34a   : > { %2248 = vperm.xlu1 %3657, %v5374_v13   ;;  %6114 = vst [vmem:[#allocation49_spill] sm:$0xff] %v5392_v51  ;;  %v5398_v14 = vpop.eup %3766  ;;  %3786 = vpow2.f32 %v2058_v54 }
 0x34b   : > { %6115 = vst [vmem:[#allocation50_spill] sm:$0xff] %v5398_v14  ;;  %v5400_v44 = vpop.eup %3768 }
 0x34c   : > { %6116 = vst [vmem:[#allocation51_spill] sm:$0xff] %v5400_v44  ;;  %v5406_v3 = vpop.eup %3770 }
 0x34d   : > { %2287 = vperm.xlu0 %3656, %v5376_v48   ;;  %6118 = vst [vmem:[#allocation9_spill] sm:$0xff] %v5406_v3  ;;  %v5408_v38 = vpop.eup %3772 }
 0x34e   : > { %2254 = vperm.xlu1 %3657, %v5382_v50   ;;  %6119 = vst [vmem:[#allocation52_spill] sm:$0xff] %v5408_v38  ;;  %v5416_v24 = vpop.eup %3774 }
 0x34f   : > { %6120 = vst [vmem:[#allocation53_spill] sm:$0xff] %v5416_v24  ;;  %v5423_v48 = vpop.eup %3776 }
 0x350   : > { %6121 = vst [vmem:[#allocation54_spill] sm:$0xff] %v5423_v48  ;;  %v5428_v12 = vpop.eup %3778 }
 0x351   : > { %2293 = vperm.xlu0 %3656, %v5384_v49   ;;  %6122 = vst [vmem:[#allocation55_spill] sm:$0xff] %v5428_v12  ;;  %v5433_v60 = vpop.eup %3780 }
 0x352   : > { %2260 = vperm.xlu1 %3657, %v5390_v57   ;;  %6123 = vst [vmem:[#allocation56_spill] sm:$0xff] %v5433_v60  ;;  %v5438_v39 = vpop.eup %3782 }
 0x353   : > { %6124 = vst [vmem:[#allocation57_spill] sm:$0xff] %v5438_v39  ;;  %v5441_v33 = vpop.eup %3784 }
 0x354   : > { %6125 = vst [vmem:[#allocation58_spill] sm:$0xff] %v5441_v33  ;;  %v5446_v15 = vpop.eup %3786 }
 0x355   : > { %2299 = vperm.xlu0 %3656, %v5392_v51   ;;  %6126 = vst [vmem:[#allocation59_spill] sm:$0xff] %v5446_v15 }
 0x356   : > { %2266 = vperm.xlu1 %3657, %v5398_v14  }
 0x359   : > { %2305 = vperm.xlu0 %3656, %v5400_v44  }
 0x35a   : > { %2272 = vperm.xlu1 %3657, %v5406_v3  }
 0x35d   : > { %2311 = vperm.xlu0 %3656, %v5408_v38  }
 0x35e   : > { %2278 = vperm.xlu1 %3657, %v5416_v24  }
 0x362   : > { %2284 = vperm.xlu1 %3657, %v5423_v48  }
 0x363   : > { %v5411_v17 = vpop.permute.xlu0 %2143 }
 0x364   : > { %v2126_v51 = vpop.permute.xlu1 %2125  ;;  %v2347_v40 = vrot.slane %v5411_v17, %v4607_v19 }
 0x365   : > { %v2319_v53 = vrot.slane %v2126_v51, %v4601_v7 }
 0x366   : > { %2290 = vperm.xlu1 %3657, %v5428_v12  }
 0x367   : > { %v5421_v44 = vpop.permute.xlu0 %2149 }
 0x368   : > { %v2129_v37 = vpop.permute.xlu1 %2128 }
 0x369   : > { %v2323_v62 = vrot.slane %v2129_v37, %v4604_v46  ;;  %v2357_v37 = vrot.slane %v5421_v44, %v4601_v7 }
 0x36a   : > { %2296 = vperm.xlu1 %3657, %v5433_v60  }
 0x36b   : > { %v5431_v4 = vpop.permute.xlu0 %2155 }
 0x36c   : > { %v2132_v38 = vpop.permute.xlu1 %2131 }
 0x36d   : > { %v2328_v22 = vrot.slane %v2132_v38, %v4607_v19  ;;  %v2324_v38 = vsel %vm1455_vm3, %v2323_v62, %v2319_v53 }
 0x36e   : > { %2302 = vperm.xlu1 %3657, %v5438_v39  }
 0x36f   : > { %v5436_v49 = vpop.permute.xlu0 %2161 }
 0x370   : > { %v2135_v20 = vpop.permute.xlu1 %2134  ;;  %v2376_v17 = vrot.slane %v5436_v49, %v4601_v7 }
 0x371   : > { %v2333_v0 = vrot.slane %v2135_v20, %v4610_v52 }
 0x372   : > { %2308 = vperm.xlu1 %3657, %v5441_v33  }
 0x373   : > { %v5444_v2 = vpop.permute.xlu0 %2167 }
 0x374   : > { %v2138_v32 = vpop.permute.xlu1 %2137  ;;  %v2385_v44 = vrot.slane %v5444_v2, %v4607_v19 }
 0x375   : > { %v2338_v10 = vrot.slane %v2138_v32, %v4601_v7 }
 0x376   : > { %2314 = vperm.xlu1 %3657, %v5446_v15  }
 0x377   : > { %v2174_v54 = vpop.permute.xlu0 %2173 }
 0x378   : > { %v2141_v60 = vpop.permute.xlu1 %2140 }
 0x379   : > { %v2342_v47 = vrot.slane %v2141_v60, %v4604_v46  ;;  %v2366_v60 = vrot.slane %v5431_v4, %v4607_v19 }
 0x37b   : > { %v5449_v12 = vpop.permute.xlu0 %2179  ;;  %v2343_v51 = vsel %vm1455_vm3, %v2342_v47, %v2338_v10 }
 0x37c   : > { %v2147_v48 = vpop.permute.xlu1 %2146  ;;  %v2348_v49 = vsel %vm1462_vm4, %v2347_v40, %v2343_v51 }
 0x37d   : > { %v2352_v20 = vrot.slane %v2147_v48, %v4610_v52  ;;  %v2395_v48 = vrot.slane %v2174_v54, %v4601_v7 }
 0x37f   : > { %v2186_v24 = vpop.permute.xlu0 %2185 }
 0x384   : > { %v2153_v35 = vpop.permute.xlu1 %2152 }
 0x385   : > { %v2361_v16 = vrot.slane %v2153_v35, %v4604_v46  ;;  %v2329_v35 = vsel %vm1462_vm4, %v2328_v22, %v2324_v38  ;;  %v2404_v22 = vrot.slane %v5449_v12, %v4607_v19 }
 0x386   : > { %v2334_v53 = vsel %vm1469_vm5, %v2333_v0, %v2329_v35  ;;  %v2414_v0 = vrot.slane %v2186_v24, %v4601_v7 }
 0x387   : > { %v2362_v10 = vsel %vm1455_vm3, %v2361_v16, %v2357_v37 }
 0x38c   : > { %v5451_v39 = vpop.permute.xlu0 %2191 }
 0x38d   : > { %v2159_v21 = vpop.permute.xlu1 %2158  ;;  %v2423_v40 = vrot.slane %v5451_v39, %v4607_v19 }
 0x38e   : > { %v2371_v47 = vrot.slane %v2159_v21, %v4610_v52 }
 0x390   : > { %v2198_v3 = vpop.permute.xlu0 %2197 }
 0x391   : > { %v2165_v14 = vpop.permute.xlu1 %2164  ;;  %v2433_v54 = vrot.slane %v2198_v3, %v4601_v7 }
 0x392   : > { %v2380_v32 = vrot.slane %v2165_v14, %v4604_v46 }
 0x394   : > { %v5453_v33 = vpop.permute.xlu0 %2203  ;;  %v2381_v16 = vsel %vm1455_vm3, %v2380_v32, %v2376_v17 }
 0x395   : > { %v2171_v31 = vpop.permute.xlu1 %2170  ;;  %v2386_v3 = vsel %vm1462_vm4, %v2385_v44, %v2381_v16 }
 0x396   : > { %v2390_v21 = vrot.slane %v2171_v31, %v4610_v52  ;;  %v2442_v31 = vrot.slane %v5453_v33, %v4607_v19 }
 0x398   : > { %v5455_v1 = vpop.permute.xlu0 %2209  ;;  %v2391_v39 = vsel %vm1469_vm5, %v2390_v21, %v2386_v3 }
 0x399   : > { %v2177_v57 = vpop.permute.xlu1 %2176  ;;  %v2452_v32 = vrot.slane %v5455_v1, %v4601_v7 }
 0x39a   : > { %v2399_v4 = vrot.slane %v2177_v57, %v4604_v46  ;;  %v2353_v57 = vsel %vm1469_vm5, %v2352_v20, %v2348_v49 }
 0x39b   : > { %v2620_v17 = vsel %vm1756_vm6, %v2353_v57, %v2334_v53 }
 0x39c   : > { %v5457_v15 = vpop.permute.xlu0 %2215  ;;  %v2400_v37 = vsel %vm1455_vm3, %v2399_v4, %v2395_v48 }
 0x39d   : > { %v2183_v50 = vpop.permute.xlu1 %2182  ;;  %v2405_v35 = vsel %vm1462_vm4, %v2404_v22, %v2400_v37  ;;  %v2461_v48 = vrot.slane %v5457_v15, %v4607_v19 }
 0x39e   : > { %v2409_v12 = vrot.slane %v2183_v50, %v4610_v52 }
 0x3a0   : > { %v5459_v13 = vpop.permute.xlu0 %2221  ;;  %v2410_v33 = vsel %vm1469_vm5, %v2409_v12, %v2405_v35 }
 0x3a1   : > { %v2189_v29 = vpop.permute.xlu1 %2188 }
 0x3a2   : > { %v2418_v62 = vrot.slane %v2189_v29, %v4604_v46  ;;  %v2367_v29 = vsel %vm1462_vm4, %v2366_v60, %v2362_v10 }
 0x3a4   : > { %v5461_v23 = vpop.permute.xlu0 %2227  ;;  %v2419_v38 = vsel %vm1455_vm3, %v2418_v62, %v2414_v0 }
 0x3a5   : > { %v2195_v43 = vpop.permute.xlu1 %2194  ;;  %v2424_v44 = vsel %vm1462_vm4, %v2423_v40, %v2419_v38 }
 0x3a6   : > { %v2428_v24 = vrot.slane %v2195_v43, %v4610_v52 }
 0x3a8   : > { %v5465_v61 = vpop.permute.xlu0 %2233  ;;  %v2429_v10 = vsel %vm1469_vm5, %v2428_v24, %v2424_v44 }
 0x3a9   : > { %v2201_v25 = vpop.permute.xlu1 %2200 }
 0x3aa   : > { %v2437_v14 = vrot.slane %v2201_v25, %v4604_v46  ;;  %v2372_v25 = vsel %vm1469_vm5, %v2371_v47, %v2367_v29 }
 0x3ab   : > { %v2621_v4 = vsel %vm1758_vm7, %v2372_v25, %v2620_v17 }
 0x3ac   : > { %v5482_v59 = vpop.permute.xlu0 %2239  ;;  %v2438_v60 = vsel %vm1455_vm3, %v2437_v14, %v2433_v54  ;;  %v2622_v1 = vsel %vm1760_vm8, %v2391_v39, %v2621_v4 }
 0x3ad   : > { %v2207_v2 = vpop.permute.xlu1 %2206  ;;  %v2443_v47 = vsel %vm1462_vm4, %v2442_v31, %v2438_v60  ;;  %v2623_v49 = vsel %vm1762_vm9, %v2410_v33, %v2622_v1  ;;  %v2490_v1 = vrot.slane %v5465_v61, %v4601_v7 }
 0x3ae   : > { %v2447_v50 = vrot.slane %v2207_v2, %v4610_v52  ;;  %v2624_v0 = vsel %vm1764_vm10, %v2429_v10, %v2623_v49  ;;  %v2471_v10 = vrot.slane %v5459_v13, %v4601_v7  ;;  %v2499_v49 = vrot.slane %v5482_v59, %v4607_v19 }
 0x3b0   : > { %v5512_v51 = vpop.permute.xlu0 %2245  ;;  %v2448_v22 = vsel %vm1469_vm5, %v2447_v50, %v2443_v47 }
 0x3b1   : > { %v2213_v20 = vpop.permute.xlu1 %2212  ;;  %v2625_v21 = vsel %vm1766_vm11, %v2448_v22, %v2624_v0 }
 0x3b2   : > { %v2456_v43 = vrot.slane %v2213_v20, %v4604_v46 }
 0x3b4   : > { %v2457_v62 = vsel %vm1455_vm3, %v2456_v43, %v2452_v32  ;;  %v5536_v14 = vpop.permute.xlu0 %2251 }
 0x3b5   : > { %v2219_v53 = vpop.permute.xlu1 %2218  ;;  %v2462_v57 = vsel %vm1462_vm4, %v2461_v48, %v2457_v62  ;;  %v2518_v0 = vrot.slane %v5536_v14, %v4607_v19 }
 0x3b6   : > { %v2466_v2 = vrot.slane %v2219_v53, %v4610_v52  ;;  %v2480_v53 = vrot.slane %v5461_v23, %v4607_v19 }
 0x3b8   : > { %v2467_v16 = vsel %vm1469_vm5, %v2466_v2, %v2462_v57  ;;  %v2258_v37 = vpop.permute.xlu0 %2257  ;;  %v2509_v2 = vrot.slane %v5512_v51, %v4601_v7 }
 0x3b9   : > { %v2225_v29 = vpop.permute.xlu1 %2224  ;;  %v2626_v15 = vsel %vm1768_vm12, %v2467_v16, %v2625_v21  ;;  %v2528_v23 = vrot.slane %v2258_v37, %v4601_v7 }
 0x3ba   : > { %v2636_v54 = vsel %vm1779_vm13, %v2626_v15, 0.0  ;;  %v2475_v44 = vrot.slane %v2225_v29, %v4604_v46 }
 0x3bb   : > { %2637 = vadd.xlane.f32.xlu0 %v2636_v54 }
 0x3bc   : > { %v2264_v25 = vpop.permute.xlu0 %2263  ;;  %v2476_v48 = vsel %vm1455_vm3, %v2475_v44, %v2471_v10 }
 0x3bd   : > { %v2231_v12 = vpop.permute.xlu1 %2230  ;;  %v2537_v29 = vrot.slane %v2264_v25, %v4607_v19  ;;  %v2481_v59 = vsel %vm1462_vm4, %v2480_v53, %v2476_v48 }
 0x3be   : > { %v2485_v13 = vrot.slane %v2231_v12, %v4610_v52 }
 0x3c0   : > { %v2270_v24 = vpop.permute.xlu0 %2269 }
 0x3c1   : > { %v2237_v40 = vpop.permute.xlu1 %2236  ;;  %v2547_v15 = vrot.slane %v2270_v24, %v4601_v7 }
 0x3c2   : > { %v2494_v47 = vrot.slane %v2237_v40, %v4604_v46 }
 0x3c4   : > { %v2276_v60 = vpop.permute.xlu0 %2275  ;;  %v2495_v61 = vsel %vm1455_vm3, %v2494_v47, %v2490_v1 }
 0x3c5   : > { %v2243_v38 = vpop.permute.xlu1 %2242  ;;  %v2500_v37 = vsel %vm1462_vm4, %v2499_v49, %v2495_v61 }
 0x3c6   : > { %v2504_v16 = vrot.slane %v2243_v38, %v4610_v52  ;;  %v2486_v38 = vsel %vm1469_vm5, %v2485_v13, %v2481_v59 }
 0x3c8   : > { %v2282_v20 = vpop.permute.xlu0 %2281 }
 0x3c9   : > { %v2249_v31 = vpop.permute.xlu1 %2248  ;;  %v2566_v24 = vrot.slane %v2282_v20, %v4601_v7 }
 0x3ca   : > { %v2513_v22 = vrot.slane %v2249_v31, %v4604_v46  ;;  %v2556_v31 = vrot.slane %v2276_v60, %v4607_v19 }
 0x3cc   : > { %v2288_v35 = vpop.permute.xlu0 %2287  ;;  %v2514_v54 = vsel %vm1455_vm3, %v2513_v22, %v2509_v2 }
 0x3cd   : > { %v2255_v3 = vpop.permute.xlu1 %2254  ;;  %v2519_v10 = vsel %vm1462_vm4, %v2518_v0, %v2514_v54  ;;  %v2575_v1 = vrot.slane %v2288_v35, %v4607_v19 }
 0x3ce   : > { %v2523_v14 = vrot.slane %v2255_v3, %v4610_v52 }
 0x3d0   : > { %v2294_v17 = vpop.permute.xlu0 %2293  ;;  %v2524_v48 = vsel %vm1469_vm5, %v2523_v14, %v2519_v10 }
 0x3d1   : > { %v2261_v50 = vpop.permute.xlu1 %2260 }
 0x3d2   : > { %v2532_v21 = vrot.slane %v2261_v50, %v4604_v46 }
 0x3d4   : > { %v2300_v62 = vpop.permute.xlu0 %2299  ;;  %v2533_v44 = vsel %vm1455_vm3, %v2532_v21, %v2528_v23 }
 0x3d5   : > { %v2267_v39 = vpop.permute.xlu1 %2266  ;;  %v2594_v53 = vrot.slane %v2300_v62, %v4607_v19 }
 0x3d6   : > { %v2542_v3 = vrot.slane %v2267_v39, %v4610_v52  ;;  %v2538_v39 = vsel %vm1462_vm4, %v2537_v29, %v2533_v44 }
 0x3d8   : > { %v2306_v12 = vpop.permute.xlu0 %2305  ;;  %v2543_v13 = vsel %vm1469_vm5, %v2542_v3, %v2538_v39  ;;  %v6129_v39 = vld [vmem:[#allocation25_spill] sm:$0xff] }
 0x3d9   : > { %v2273_v32 = vpop.permute.xlu1 %2272 }
 0x3da   : > { %v2551_v51 = vrot.slane %v2273_v32, %v4604_v46  ;;  %v2505_v32 = vsel %vm1469_vm5, %v2504_v16, %v2500_v37 }
 0x3dc   : > { %v2552_v47 = vsel %vm1455_vm3, %v2551_v51, %v2547_v15  ;;  %v2312_v35 = vpop.permute.xlu0 %2311 }
 0x3dd   : > { %v2279_v43 = vpop.permute.xlu1 %2278  ;;  %v2613_v51 = vrot.slane %v2312_v35, %v4607_v19 }
 0x3de   : > { %v2561_v60 = vrot.slane %v2279_v43, %v4610_v52  ;;  %v2604_v43 = vrot.slane %v2306_v12, %v4601_v7 }
 0x3e1   : > { %v2285_v33 = vpop.permute.xlu1 %2284 }
 0x3e2   : > { %v2570_v40 = vrot.slane %v2285_v33, %v4604_v46  ;;  %v2585_v33 = vrot.slane %v2294_v17, %v4601_v7 }
 0x3e4   : > { %v2571_v22 = vsel %vm1455_vm3, %v2570_v40, %v2566_v24 }
 0x3e5   : > { %v2291_v4 = vpop.permute.xlu1 %2290  ;;  %v2576_v61 = vsel %vm1462_vm4, %v2575_v1, %v2571_v22 }
 0x3e6   : > { %v2580_v20 = vrot.slane %v2291_v4, %v4610_v52  ;;  %v2627_v4 = vsel %vm1756_vm6, %v2505_v32, %v2486_v38 }
 0x3e7   : > { %v2628_v16 = vsel %vm1758_vm7, %v2524_v48, %v2627_v4  ;;  %v6128_v48 = vld [vmem:[#allocation18_spill] sm:$0xff] }
 0x3e8   : > { %v2581_v21 = vsel %vm1469_vm5, %v2580_v20, %v2576_v61  ;;  %v2629_v59 = vsel %vm1760_vm8, %v2543_v13, %v2628_v16  ;;  %v6132_v13 = vld [vmem:[#allocation26_spill] sm:$0xff]  ;;  %v6134_v61 = vld [vmem:[#allocation17_spill] sm:$0xff] }
 0x3e9   : > { %v2297_v57 = vpop.permute.xlu1 %2296 }
 0x3ea   : > { %v2589_v25 = vrot.slane %v2297_v57, %v4604_v46  ;;  %v2557_v57 = vsel %vm1462_vm4, %v2556_v31, %v2552_v47 }
 0x3eb   : > { %v2562_v62 = vsel %vm1469_vm5, %v2561_v60, %v2557_v57  ;;  %v6127_v60 = vld [vmem:[#allocation12_spill] sm:$0xff] }
 0x3ec   : > { %v2590_v49 = vsel %vm1455_vm3, %v2589_v25, %v2585_v33  ;;  %v2630_v14 = vsel %vm1762_vm9, %v2562_v62, %v2629_v59  ;;  %v6135_v59 = vld [vmem:[#allocation15_spill] sm:$0xff] }
 0x3ed   : > { %v2303_v50 = vpop.permute.xlu1 %2302  ;;  %v2595_v23 = vsel %vm1462_vm4, %v2594_v53, %v2590_v49  ;;  %v2631_v38 = vsel %vm1764_vm10, %v2581_v21, %v2630_v14 }
 0x3ee   : > { %v2599_v17 = vrot.slane %v2303_v50, %v4610_v52 }
 0x3f0   : > { %v2600_v15 = vsel %vm1469_vm5, %v2599_v17, %v2595_v23  ;;  %v6130_v17 = vld [vmem:[#allocation8_spill] sm:$0xff] }
 0x3f1   : > { %v2309_v2 = vpop.permute.xlu1 %2308  ;;  %v2632_v37 = vsel %vm1766_vm11, %v2600_v15, %v2631_v38 }
 0x3f2   : > { %v2608_v0 = vrot.slane %v2309_v2, %v4604_v46 }
 0x3f4   : > { %v2609_v29 = vsel %vm1455_vm3, %v2608_v0, %v2604_v43  ;;  %v6133_v0 = vld [vmem:[#allocation14_spill] sm:$0xff] }
 0x3f5   : > { %v2315_v54 = vpop.permute.xlu1 %2314  ;;  %v2614_v40 = vsel %vm1462_vm4, %v2613_v51, %v2609_v29 }
 0x3f6   : > { %v2618_v12 = vrot.slane %v2315_v54, %v4610_v52 }
 0x3f8   : > { %v2619_v31 = vsel %vm1469_vm5, %v2618_v12, %v2614_v40  ;;  %v6137_v40 = vld [vmem:[#allocation7_spill] sm:$0xff] }
 0x3f9   : > { %v2633_v25 = vsel %vm1768_vm12, %v2619_v31, %v2632_v37 }
 0x3fa   : > { %v2639_v50 = vsel %vm1779_vm13, %v2633_v25, 0.0 }
 0x3fb   : > { %2640 = vadd.xlane.f32.xlu1 %v2639_v50 }
 0x448   : > { %v5615_v32 = vpop.xlane.xlu0 %2637 }
 0x449   : > { %v2647_v24 = vrot.slane %v5615_v32, %v6046_v56  ;;  %v2651_v44 = vrot.slane %v5615_v32, %v5043_v63  ;;  %v2655_v10 = vrot.slane %v5615_v32, %v5046_v6  ;;  %v2659_v53 = vrot.slane %v5615_v32, %v5061_v9 }
 0x44a   : > { %v2663_v57 = vrot.slane %v5615_v32, %v5074_v41  ;;  %v2667_v29 = vrot.slane %v5615_v32, %v5090_v5 }
 0x44b   : > { %3788 = vrcp.f32 %v2647_v24  ;;  %v6139_v24 = vld [vmem:[#allocation20_spill] sm:$0xff] }
 0x44c   : > { %3790 = vrcp.f32 %v2651_v44 }
 0x44d   : > { %3792 = vrcp.f32 %v2655_v10 }
 0x44e   : > { %3794 = vrcp.f32 %v2659_v53 }
 0x44f   : > { %3796 = vrcp.f32 %v2663_v57  ;;  %v6148_v57 = vld [vmem:[#allocation37_spill] sm:$0xff] }
 0x450   : > { %3798 = vrcp.f32 %v2667_v29 }
 0x455   : > { %v3789_v3 = vpop.eup %3788 }
 0x456   : > { %v2725_v33 = vmul.f32 %v3789_v3, %v5094_v8  ;;  %v2726_v47 = vmul.f32 %v3789_v3, %v5107_v11  ;;  %v2727_v1 = vmul.f32 %v3789_v3, %v6127_v60  ;;  %v2728_v22 = vmul.f32 %v3789_v3, %v6128_v48  ;;  %v3791_v20 = vpop.eup %3790  ;;  %v6131_v8 = vld [vmem:[#allocation10_spill] sm:$0xff]  ;;  %v6141_v60 = vld [vmem:[#allocation29_spill] sm:$0xff] }
 0x457   : > { %v2730_v49 = vmul.f32 %v3791_v20, %v6129_v39  ;;  %v2731_v2 = vmul.f32 %v3791_v20, %v6130_v17  ;;  %v2732_v11 = vmul.f32 %v3791_v20, %v6131_v8  ;;  %v2733_v43 = vmul.f32 %v3791_v20, %v6132_v13  ;;  %v3793_v35 = vpop.eup %3792  ;;  %v6142_v48 = vld [vmem:[#allocation21_spill] sm:$0xff]  ;;  %v6143_v20 = vld [vmem:[#allocation30_spill] sm:$0xff]  ;;  %v6146_v8 = vld [vmem:[#allocation31_spill] sm:$0xff] }
 0x458   : > { %2869 = vperm.xlu0 %3656, %v2725_v33   ;;  %2872 = vperm.xlu1 %3657, %v2726_v47   ;;  %v2735_v4 = vmul.f32 %v3793_v35, %v6133_v0  ;;  %v2736_v62 = vmul.f32 %v3793_v35, %v5186_v26  ;;  %v2737_v16 = vmul.f32 %v3793_v35, %v6134_v61  ;;  %v3795_v23 = vpop.eup %3794  ;;  %v6136_v26 = vld [vmem:[#allocation16_spill] sm:$0xff]  ;;  %v6144_v39 = vld [vmem:[#allocation22_spill] sm:$0xff]  ;;  %v6145_v17 = vld [vmem:[#allocation33_spill] sm:$0xff] }
 0x459   : > { %v2738_v21 = vmul.f32 %v3793_v35, %v5196_v45  ;;  %v2740_v51 = vmul.f32 %v3795_v23, %v6135_v59  ;;  %v2741_v15 = vmul.f32 %v3795_v23, %v5210_v34  ;;  %v2742_v54 = vmul.f32 %v3795_v23, %v6136_v26  ;;  %v3797_v12 = vpop.eup %3796  ;;  %v6138_v34 = vld [vmem:[#allocation19_spill] sm:$0xff]  ;;  %v6152_v59 = vld [vmem:[#allocation13_spill] sm:$0xff] }
 0x45a   : > { %v2743_v14 = vmul.f32 %v3795_v23, %v5220_v28  ;;  %v2671_v45 = vrot.slane %v5615_v32, %v5147_v42  ;;  %v2745_v38 = vmul.f32 %v3797_v12, %v6137_v40  ;;  %v2746_v31 = vmul.f32 %v3797_v12, %v5234_v18  ;;  %v3799_v50 = vpop.eup %3798 }
 0x45b   : > { %v2747_v37 = vmul.f32 %v3797_v12, %v6138_v34  ;;  %v2748_v25 = vmul.f32 %v3797_v12, %v5244_v27  ;;  %v2675_v28 = vrot.slane %v5615_v32, %v5160_v55  ;;  %v2750_v44 = vmul.f32 %v3799_v50, %v6139_v24  ;;  %v6140_v27 = vld [vmem:[#allocation28_spill] sm:$0xff]  ;;  %v6155_v12 = vld [vmem:[#allocation34_spill] sm:$0xff] }
 0x45c   : > { %2875 = vperm.xlu0 %3656, %v2727_v1   ;;  %2878 = vperm.xlu1 %3657, %v2728_v22   ;;  %3800 = vrcp.f32 %v2671_v45  ;;  %v2751_v3 = vmul.f32 %v3799_v50, %v5258_v58  ;;  %v2752_v18 = vmul.f32 %v3799_v50, %v5188_v30  ;;  %v2753_v10 = vmul.f32 %v3799_v50, %v5268_v36  ;;  %v6159_v50 = vld [vmem:[#allocation35_spill] sm:$0xff] }
 0x45d   : > { %3802 = vrcp.f32 %v2675_v28 }
 0x460   : > { %2881 = vperm.xlu0 %3656, %v2730_v49   ;;  %2884 = vperm.xlu1 %3657, %v2731_v2  }
 0x464   : > { %2887 = vperm.xlu0 %3656, %v2732_v11   ;;  %2890 = vperm.xlu1 %3657, %v2733_v43   ;;  %v6147_v11 = vld [vmem:[#allocation36_spill] sm:$0xff] }
 0x466   : > { %v3801_v33 = vpop.eup %3800 }
 0x467   : > { %v2755_v47 = vmul.f32 %v3801_v33, %v6140_v27  ;;  %v2756_v1 = vmul.f32 %v3801_v33, %v6141_v60  ;;  %v2757_v22 = vmul.f32 %v3801_v33, %v6142_v48  ;;  %v2758_v30 = vmul.f32 %v3801_v33, %v6143_v20  ;;  %v3803_v53 = vpop.eup %3802  ;;  %v6163_v60 = vld [vmem:[#allocation38_spill] sm:$0xff] }
 0x468   : > { %2893 = vperm.xlu0 %3656, %v2735_v4   ;;  %2896 = vperm.xlu1 %3657, %v2736_v62   ;;  %v2760_v49 = vmul.f32 %v3803_v53, %v6144_v39  ;;  %v2761_v2 = vmul.f32 %v3803_v53, %v6145_v17  ;;  %v2763_v13 = vmul.f32 %v3803_v53, %v6147_v11  ;;  %v6150_v62 = vld [vmem:[#allocation39_spill] sm:$0xff]  ;;  %v6168_v17 = vld [vmem:[#allocation53_spill] sm:$0xff] }
 0x46c   : > { %2899 = vperm.xlu0 %3656, %v2737_v16   ;;  %2902 = vperm.xlu1 %3657, %v2738_v21   ;;  %v6151_v16 = vld [vmem:[#allocation24_spill] sm:$0xff] }
 0x470   : > { %2905 = vperm.xlu0 %3656, %v2740_v51   ;;  %2908 = vperm.xlu1 %3657, %v2741_v15  }
 0x474   : > { %2911 = vperm.xlu0 %3656, %v2742_v54   ;;  %2914 = vperm.xlu1 %3657, %v2743_v14   ;;  %v6154_v54 = vld [vmem:[#allocation44_spill] sm:$0xff] }
 0x478   : > { %2917 = vperm.xlu0 %3656, %v2745_v38   ;;  %2920 = vperm.xlu1 %3657, %v2746_v31   ;;  %v6156_v38 = vld [vmem:[#allocation43_spill] sm:$0xff]  ;;  %v6157_v31 = vld [vmem:[#allocation32_spill] sm:$0xff] }
 0x47c   : > { %2923 = vperm.xlu0 %3656, %v2747_v37   ;;  %2926 = vperm.xlu1 %3657, %v2748_v25   ;;  %v6158_v25 = vld [vmem:[#allocation47_spill] sm:$0xff] }
 0x480   : > { %2929 = vperm.xlu0 %3656, %v2750_v44   ;;  %2932 = vperm.xlu1 %3657, %v2751_v3   ;;  %v6160_v44 = vld [vmem:[#allocation11_spill] sm:$0xff] }
 0x484   : > { %2935 = vperm.xlu0 %3656, %v2752_v18   ;;  %2938 = vperm.xlu1 %3657, %v2753_v10   ;;  %v6161_v18 = vld [vmem:[#allocation42_spill] sm:$0xff] }
 0x488   : > { %2941 = vperm.xlu0 %3656, %v2755_v47   ;;  %2944 = vperm.xlu1 %3657, %v2756_v1   ;;  %v5659_v32 = vpop.xlane.xlu1 %2640  ;;  %v6162_v47 = vld [vmem:[#allocation40_spill] sm:$0xff] }
 0x489   : > { %v2679_v58 = vrot.slane %v5659_v32, %v6046_v56  ;;  %v2683_v36 = vrot.slane %v5659_v32, %v5043_v63  ;;  %v2762_v56 = vmul.f32 %v3803_v53, %v6146_v8  ;;  %v2687_v35 = vrot.slane %v5659_v32, %v5046_v6  ;;  %v6149_v63 = vld [vmem:[#allocation23_spill] sm:$0xff]  ;;  %v6169_v8 = vld [vmem:[#allocation54_spill] sm:$0xff] }
 0x48a   : > { %v2691_v29 = vrot.slane %v5659_v32, %v5061_v9  ;;  %v6153_v6 = vld [vmem:[#allocation27_spill] sm:$0xff]  ;;  %v2695_v26 = vrot.slane %v5659_v32, %v5074_v41  ;;  %v2699_v37 = vrot.slane %v5659_v32, %v5090_v5  ;;  %v2703_v27 = vrot.slane %v5659_v32, %v5147_v42  ;;  %v6167_v42 = vld [vmem:[#allocation41_spill] sm:$0xff] }
 0x48b   : > { %3804 = vrcp.f32 %v2679_v58  ;;  %v6164_v58 = vld [vmem:[#allocation50_spill] sm:$0xff]  ;;  %v2707_v53 = vrot.slane %v5659_v32, %v5160_v55  ;;  %v6172_v55 = vld [vmem:[#allocation55_spill] sm:$0xff] }
 0x48c   : > { %2947 = vperm.xlu0 %3656, %v2757_v22   ;;  %2950 = vperm.xlu1 %3657, %v2758_v30   ;;  %3806 = vrcp.f32 %v2683_v36  ;;  %v6165_v22 = vld [vmem:[#allocation9_spill] sm:$0xff] }
 0x48d   : > { %3808 = vrcp.f32 %v2687_v35  ;;  %v6166_v36 = vld [vmem:[#allocation45_spill] sm:$0xff]  ;;  %v6171_v35 = vld [vmem:[#allocation46_spill] sm:$0xff] }
 0x48e   : > { %3810 = vrcp.f32 %v2691_v29 }
 0x48f   : > { %3812 = vrcp.f32 %v2695_v26  ;;  %v6179_v26 = vld [vmem:[#allocation52_spill] sm:$0xff] }
 0x490   : > { %2953 = vperm.xlu0 %3656, %v2760_v49   ;;  %2956 = vperm.xlu1 %3657, %v2761_v2   ;;  %3814 = vrcp.f32 %v2699_v37 }
 0x491   : > { %3816 = vrcp.f32 %v2703_v27 }
 0x492   : > { %3818 = vrcp.f32 %v2707_v53 }
 0x494   : > { %2959 = vperm.xlu0 %3656, %v2762_v56   ;;  %2962 = vperm.xlu1 %3657, %v2763_v13   ;;  %v6170_v13 = vld [vmem:[#allocation48_spill] sm:$0xff] }
 0x495   : > { %v3805_v43 = vpop.eup %3804 }
 0x496   : > { %v2766_v0 = vmul.f32 %v3805_v43, %v6148_v57  ;;  %v2765_v4 = vmul.f32 %v3805_v43, %v6149_v63  ;;  %v2768_v61 = vmul.f32 %v3805_v43, %v6150_v62  ;;  %v2767_v21 = vmul.f32 %v3805_v43, %v6151_v16  ;;  %v3807_v23 = vpop.eup %3806  ;;  %v6174_v62 = vld [vmem:[#allocation51_spill] sm:$0xff]  ;;  %v6175_v16 = vld [vmem:[#allocation49_spill] sm:$0xff] }
 0x497   : > { %v2771_v51 = vmul.f32 %v3807_v23, %v6152_v59  ;;  %v2770_v15 = vmul.f32 %v3807_v23, %v6153_v6  ;;  %v2773_v14 = vmul.f32 %v3807_v23, %v6154_v54  ;;  %v2772_v45 = vmul.f32 %v3807_v23, %v6155_v12  ;;  %v3809_v40 = vpop.eup %3808  ;;  %v6176_v23 = vld [vmem:[#allocation57_spill] sm:$0xff]  ;;  %v6177_v59 = vld [vmem:[#allocation58_spill] sm:$0xff]  ;;  %v6178_v6 = vld [vmem:[#allocation59_spill] sm:$0xff] }
 0x498   : > { %2968 = vperm.xlu1 %3657, %v2766_v0   ;;  %2965 = vperm.xlu0 %3656, %v2765_v4   ;;  %v2776_v9 = vmul.f32 %v3809_v40, %v6156_v38  ;;  %v2775_v34 = vmul.f32 %v3809_v40, %v6157_v31  ;;  %v2778_v41 = vmul.f32 %v3809_v40, %v6158_v25  ;;  %v3811_v24 = vpop.eup %3810  ;;  %v6173_v0 = vld [vmem:[#allocation56_spill] sm:$0xff] }
 0x499   : > { %v2777_v28 = vmul.f32 %v3809_v40, %v6159_v50  ;;  %v2781_v3 = vmul.f32 %v3811_v24, %v6160_v44  ;;  %v2780_v10 = vmul.f32 %v3811_v24, %v6161_v18  ;;  %v3813_v33 = vpop.eup %3812  ;;  %v2782_v1 = vmul.f32 %v3811_v24, %v6163_v60 }
 0x49a   : > { %v2785_v5 = vmul.f32 %v3813_v33, %v6162_v47  ;;  %v2783_v48 = vmul.f32 %v3811_v24, %v6164_v58  ;;  %v2786_v20 = vmul.f32 %v3813_v33, %v6165_v22  ;;  %v3815_v30 = vpop.eup %3814  ;;  %v2787_v49 = vmul.f32 %v3813_v33, %v6167_v42 }
 0x49b   : > { %v2790_v39 = vmul.f32 %v3815_v30, %v6166_v36  ;;  %v2788_v2 = vmul.f32 %v3813_v33, %v6168_v17  ;;  %v2791_v56 = vmul.f32 %v3815_v30, %v6169_v8  ;;  %v3817_v11 = vpop.eup %3816  ;;  %v2792_v57 = vmul.f32 %v3815_v30, %v6171_v35 }
 0x49c   : > { %2974 = vperm.xlu1 %3657, %v2768_v61   ;;  %2971 = vperm.xlu0 %3656, %v2767_v21   ;;  %v2795_v43 = vmul.f32 %v3817_v11, %v6170_v13  ;;  %v2793_v32 = vmul.f32 %v3815_v30, %v6172_v55  ;;  %v2796_v63 = vmul.f32 %v3817_v11, %v6173_v0  ;;  %v3819_v4 = vpop.eup %3818 }
 0x49d   : > { %v2800_v61 = vmul.f32 %v3819_v4, %v6174_v62  ;;  %v2797_v21 = vmul.f32 %v3817_v11, %v6175_v16  ;;  %v2798_v29 = vmul.f32 %v3817_v11, %v6176_v23  ;;  %v2802_v54 = vmul.f32 %v3819_v4, %v6179_v26 }
 0x4a0   : > { %2980 = vperm.xlu1 %3657, %v2771_v51   ;;  %2977 = vperm.xlu0 %3656, %v2770_v15   ;;  %v2801_v51 = vmul.f32 %v3819_v4, %v6177_v59  ;;  %v2803_v15 = vmul.f32 %v3819_v4, %v6178_v6 }
 0x4a4   : > { %2986 = vperm.xlu1 %3657, %v2773_v14   ;;  %2983 = vperm.xlu0 %3656, %v2772_v45  }
 0x4a8   : > { %2992 = vperm.xlu1 %3657, %v2776_v9   ;;  %2989 = vperm.xlu0 %3656, %v2775_v34  }
 0x4ac   : > { %2998 = vperm.xlu1 %3657, %v2778_v41   ;;  %2995 = vperm.xlu0 %3656, %v2777_v28  }
 0x4b0   : > { %3004 = vperm.xlu1 %3657, %v2781_v3   ;;  %3001 = vperm.xlu0 %3656, %v2780_v10  }
 0x4b4   : > { %3013 = vperm.xlu1 %3657, %v2785_v5   ;;  %3007 = vperm.xlu0 %3656, %v2782_v1  }
 0x4b8   : > { %3010 = vperm.xlu1 %3657, %v2783_v48   ;;  %3016 = vperm.xlu0 %3656, %v2786_v20  }
 0x4bc   : > { %3025 = vperm.xlu1 %3657, %v2790_v39   ;;  %3019 = vperm.xlu0 %3656, %v2787_v49  }
 0x4c0   : > { %3022 = vperm.xlu1 %3657, %v2788_v2   ;;  %3028 = vperm.xlu0 %3656, %v2791_v56  }
 0x4c4   : > { %3037 = vperm.xlu1 %3657, %v2795_v43   ;;  %3031 = vperm.xlu0 %3656, %v2792_v57  }
 0x4c8   : > { %3034 = vperm.xlu1 %3657, %v2793_v32   ;;  %3040 = vperm.xlu0 %3656, %v2796_v63  }
 0x4cc   : > { %3049 = vperm.xlu1 %3657, %v2800_v61   ;;  %3043 = vperm.xlu0 %3656, %v2797_v21  }
 0x4d0   : > { %3046 = vperm.xlu1 %3657, %v2798_v29   ;;  %3052 = vperm.xlu0 %3656, %v2801_v51  }
 0x4d4   : > { %3058 = vperm.xlu1 %3657, %v2803_v15   ;;  %3055 = vperm.xlu0 %3656, %v2802_v54  }
 0x4d7   : > { %v2870_v14 = vpop.permute.xlu0 %2869  ;;  %v2873_v12 = vpop.permute.xlu1 %2872 }
 0x4d8   : > { %v3063_v60 = vrot.slane %v2870_v14, %v4601_v7  ;;  %v3067_v1 = vrot.slane %v2873_v12, %v4604_v46 }
 0x4da   : > { %v3068_v36 = vsel %vm1455_vm3, %v3067_v1, %v3063_v60 }
 0x4db   : > { %v2876_v45 = vpop.permute.xlu0 %2875  ;;  %v2879_v40 = vpop.permute.xlu1 %2878 }
 0x4dc   : > { %v3072_v22 = vrot.slane %v2876_v45, %v4607_v19  ;;  %v3077_v8 = vrot.slane %v2879_v40, %v4610_v52 }
 0x4de   : > { %v3073_v2 = vsel %vm1462_vm4, %v3072_v22, %v3068_v36 }
 0x4df   : > { %v2882_v38 = vpop.permute.xlu0 %2881  ;;  %v2885_v9 = vpop.permute.xlu1 %2884  ;;  %v3078_v14 = vsel %vm1469_vm5, %v3077_v8, %v3073_v2 }
 0x4e0   : > { %v3082_v20 = vrot.slane %v2882_v38, %v4601_v7  ;;  %v3086_v30 = vrot.slane %v2885_v9, %v4604_v46 }
 0x4e2   : > { %v3087_v56 = vsel %vm1455_vm3, %v3086_v30, %v3082_v20 }
 0x4e3   : > { %v2888_v31 = vpop.permute.xlu0 %2887  ;;  %v2891_v34 = vpop.permute.xlu1 %2890 }
 0x4e4   : > { %v3091_v53 = vrot.slane %v2888_v31, %v4607_v19  ;;  %v3096_v11 = vrot.slane %v2891_v34, %v4610_v52 }
 0x4e6   : > { %v3092_v57 = vsel %vm1462_vm4, %v3091_v53, %v3087_v56 }
 0x4e7   : > { %v2894_v37 = vpop.permute.xlu0 %2893  ;;  %v2897_v25 = vpop.permute.xlu1 %2896  ;;  %v3097_v38 = vsel %vm1469_vm5, %v3096_v11, %v3092_v57 }
 0x4e8   : > { %v3101_v39 = vrot.slane %v2894_v37, %v4601_v7  ;;  %v3105_v42 = vrot.slane %v2897_v25, %v4604_v46 }
 0x4ea   : > { %v3106_v63 = vsel %vm1455_vm3, %v3105_v42, %v3101_v39 }
 0x4eb   : > { %v2900_v41 = vpop.permute.xlu0 %2899  ;;  %v2903_v50 = vpop.permute.xlu1 %2902 }
 0x4ec   : > { %v3110_v13 = vrot.slane %v2900_v41, %v4607_v19  ;;  %v3115_v23 = vrot.slane %v2903_v50, %v4610_v52 }
 0x4ee   : > { %v3111_v6 = vsel %vm1462_vm4, %v3110_v13, %v3106_v63 }
 0x4ef   : > { %v2906_v28 = vpop.permute.xlu0 %2905  ;;  %v2909_v24 = vpop.permute.xlu1 %2908  ;;  %v3116_v41 = vsel %vm1469_vm5, %v3115_v23, %v3111_v6 }
 0x4f0   : > { %v3120_v43 = vrot.slane %v2906_v28, %v4601_v7  ;;  %v3124_v35 = vrot.slane %v2909_v24, %v4604_v46 }
 0x4f2   : > { %v3125_v15 = vsel %vm1455_vm3, %v3124_v35, %v3120_v43 }
 0x4f3   : > { %v2912_v44 = vpop.permute.xlu0 %2911  ;;  %v2915_v3 = vpop.permute.xlu1 %2914 }
 0x4f4   : > { %v3129_v55 = vrot.slane %v2912_v44, %v4607_v19  ;;  %v3134_v26 = vrot.slane %v2915_v3, %v4610_v52 }
 0x4f6   : > { %v3130_v12 = vsel %vm1462_vm4, %v3129_v55, %v3125_v15 }
 0x4f7   : > { %v2918_v18 = vpop.permute.xlu0 %2917  ;;  %v2921_v10 = vpop.permute.xlu1 %2920  ;;  %v3135_v44 = vsel %vm1469_vm5, %v3134_v26, %v3130_v12 }
 0x4f8   : > { %v3139_v32 = vrot.slane %v2918_v18, %v4601_v7  ;;  %v3143_v0 = vrot.slane %v2921_v10, %v4604_v46 }
 0x4fa   : > { %v3144_v45 = vsel %vm1455_vm3, %v3143_v0, %v3139_v32 }
 0x4fb   : > { %v2924_v33 = vpop.permute.xlu0 %2923  ;;  %v2927_v27 = vpop.permute.xlu1 %2926 }
 0x4fc   : > { %v3148_v4 = vrot.slane %v2924_v33, %v4607_v19  ;;  %v3153_v40 = vrot.slane %v2927_v27, %v4610_v52  ;;  %v3364_v33 = vsel %vm1756_vm6, %v3097_v38, %v3078_v14 }
 0x4fe   : > { %v3149_v9 = vsel %vm1462_vm4, %v3148_v4, %v3144_v45 }
 0x4ff   : > { %v2930_v47 = vpop.permute.xlu0 %2929  ;;  %v2933_v5 = vpop.permute.xlu1 %2932  ;;  %v3154_v27 = vsel %vm1469_vm5, %v3153_v40, %v3149_v9 }
 0x500   : > { %v3158_v62 = vrot.slane %v2930_v47, %v4601_v7  ;;  %v3162_v61 = vrot.slane %v2933_v5, %v4604_v46  ;;  %v3365_v47 = vsel %vm1758_vm7, %v3116_v41, %v3364_v33 }
 0x502   : > { %v3163_v31 = vsel %vm1455_vm3, %v3162_v61, %v3158_v62 }
 0x503   : > { %v2936_v58 = vpop.permute.xlu0 %2935  ;;  %v2939_v48 = vpop.permute.xlu1 %2938 }
 0x504   : > { %v3167_v29 = vrot.slane %v2936_v58, %v4607_v19  ;;  %v3172_v34 = vrot.slane %v2939_v48, %v4610_v52  ;;  %v3366_v58 = vsel %vm1760_vm8, %v3135_v44, %v3365_v47 }
 0x505   : > { %v3367_v30 = vsel %vm1762_vm9, %v3154_v27, %v3366_v58 }
 0x506   : > { %v3168_v50 = vsel %vm1462_vm4, %v3167_v29, %v3163_v31 }
 0x507   : > { %v2942_v49 = vpop.permute.xlu0 %2941  ;;  %v2945_v17 = vpop.permute.xlu1 %2944  ;;  %v3173_v5 = vsel %vm1469_vm5, %v3172_v34, %v3168_v50 }
 0x508   : > { %v3177_v59 = vrot.slane %v2942_v49, %v4601_v7  ;;  %v3181_v51 = vrot.slane %v2945_v17, %v4604_v46  ;;  %v3368_v36 = vsel %vm1764_vm10, %v3173_v5, %v3367_v30 }
 0x50a   : > { %v3182_v28 = vsel %vm1455_vm3, %v3181_v51, %v3177_v59 }
 0x50b   : > { %v2948_v16 = vpop.permute.xlu0 %2947  ;;  %v2951_v21 = vpop.permute.xlu1 %2950 }
 0x50c   : > { %v3186_v54 = vrot.slane %v2948_v16, %v4607_v19  ;;  %v3191_v24 = vrot.slane %v2951_v21, %v4610_v52 }
 0x50e   : > { %v3187_v3 = vsel %vm1462_vm4, %v3186_v54, %v3182_v28 }
 0x50f   : > { %v2954_v37 = vpop.permute.xlu0 %2953  ;;  %v2957_v25 = vpop.permute.xlu1 %2956  ;;  %v3192_v48 = vsel %vm1469_vm5, %v3191_v24, %v3187_v3 }
 0x510   : > { %v3196_v18 = vrot.slane %v2954_v37, %v4601_v7  ;;  %v3200_v10 = vrot.slane %v2957_v25, %v4604_v46  ;;  %v3369_v42 = vsel %vm1766_vm11, %v3192_v48, %v3368_v36 }
 0x512   : > { %v3201_v53 = vsel %vm1455_vm3, %v3200_v10, %v3196_v18 }
 0x513   : > { %v2960_v60 = vpop.permute.xlu0 %2959  ;;  %v2963_v1 = vpop.permute.xlu1 %2962 }
 0x514   : > { %v3205_v22 = vrot.slane %v2960_v60, %v4607_v19  ;;  %v3210_v20 = vrot.slane %v2963_v1, %v4610_v52 }
 0x516   : > { %v3206_v39 = vsel %vm1462_vm4, %v3205_v22, %v3201_v53 }
 0x517   : > { %v3211_v49 = vsel %vm1469_vm5, %v3210_v20, %v3206_v39  ;;  %v2966_v17 = vpop.permute.xlu0 %2965  ;;  %v2969_v2 = vpop.permute.xlu1 %2968 }
 0x518   : > { %v3370_v8 = vsel %vm1768_vm12, %v3211_v49, %v3369_v42  ;;  %v3215_v54 = vrot.slane %v2966_v17, %v4601_v7  ;;  %v3219_v14 = vrot.slane %v2969_v2, %v4604_v46 }
 0x519   : > { %3380 = vst.msk [vmem:[%s5779_s12] sm:$0xff] %vm1779_vm13, %v3370_v8 }
 0x51a   : > { %v3220_v41 = vsel %vm1455_vm3, %v3219_v14, %v3215_v54 }
 0x51b   : > { %v2972_v56 = vpop.permute.xlu0 %2971  ;;  %v2975_v11 = vpop.permute.xlu1 %2974 }
 0x51c   : > { %v3224_v40 = vrot.slane %v2972_v56, %v4607_v19  ;;  %v3229_v50 = vrot.slane %v2975_v11, %v4610_v52 }
 0x51e   : > { %v3225_v44 = vsel %vm1462_vm4, %v3224_v40, %v3220_v41 }
 0x51f   : > { %v2978_v13 = vpop.permute.xlu0 %2977  ;;  %v2981_v43 = vpop.permute.xlu1 %2980  ;;  %v3230_v1 = vsel %vm1469_vm5, %v3229_v50, %v3225_v44 }
 0x520   : > { %v3234_v12 = vrot.slane %v2978_v13, %v4601_v7  ;;  %v3238_v45 = vrot.slane %v2981_v43, %v4604_v46 }
 0x522   : > { %v3239_v28 = vsel %vm1455_vm3, %v3238_v45, %v3234_v12 }
 0x523   : > { %v2984_v35 = vpop.permute.xlu0 %2983  ;;  %v2987_v57 = vpop.permute.xlu1 %2986 }
 0x524   : > { %v3243_v38 = vrot.slane %v2984_v35, %v4607_v19  ;;  %v3248_v24 = vrot.slane %v2987_v57, %v4610_v52 }
 0x526   : > { %v3244_v3 = vsel %vm1462_vm4, %v3243_v38, %v3239_v28 }
 0x527   : > { %v2990_v55 = vpop.permute.xlu0 %2989  ;;  %v2993_v32 = vpop.permute.xlu1 %2992  ;;  %v3249_v58 = vsel %vm1469_vm5, %v3248_v24, %v3244_v3 }
 0x528   : > { %v3253_v9 = vrot.slane %v2990_v55, %v4601_v7  ;;  %v3257_v31 = vrot.slane %v2993_v32, %v4604_v46 }
 0x52a   : > { %v3258_v18 = vsel %vm1455_vm3, %v3257_v31, %v3253_v9 }
 0x52b   : > { %v2996_v0 = vpop.permute.xlu0 %2995  ;;  %v2999_v63 = vpop.permute.xlu1 %2998 }
 0x52c   : > { %v3262_v34 = vrot.slane %v2996_v0, %v4607_v19  ;;  %v3267_v10 = vrot.slane %v2999_v63, %v4610_v52 }
 0x52e   : > { %v3263_v33 = vsel %vm1462_vm4, %v3262_v34, %v3258_v18 }
 0x52f   : > { %v3002_v4 = vpop.permute.xlu0 %3001  ;;  %v3005_v62 = vpop.permute.xlu1 %3004  ;;  %v3268_v20 = vsel %vm1469_vm5, %v3267_v10, %v3263_v33 }
 0x530   : > { %v3272_v27 = vrot.slane %v3002_v4, %v4601_v7  ;;  %v3276_v47 = vrot.slane %v3005_v62, %v4604_v46 }
 0x532   : > { %v3277_v2 = vsel %vm1455_vm3, %v3276_v47, %v3272_v27 }
 0x533   : > { %v3008_v61 = vpop.permute.xlu0 %3007  ;;  %v3014_v16 = vpop.permute.xlu1 %3013 }
 0x534   : > { %v3281_v48 = vrot.slane %v3008_v61, %v4607_v19  ;;  %v3291_v39 = vrot.slane %v3014_v16, %v4601_v7  ;;  %v3371_v61 = vsel %vm1756_vm6, %v3249_v58, %v3230_v1 }
 0x536   : > { %v3282_v35 = vsel %vm1462_vm4, %v3281_v48, %v3277_v2 }
 0x537   : > { %v3017_v21 = vpop.permute.xlu0 %3016  ;;  %v3011_v23 = vpop.permute.xlu1 %3010 }
 0x538   : > { %v3295_v22 = vrot.slane %v3017_v21, %v4604_v46  ;;  %v3286_v30 = vrot.slane %v3011_v23, %v4610_v52 }
 0x53a   : > { %v3296_v57 = vsel %vm1455_vm3, %v3295_v22, %v3291_v39  ;;  %v3287_v0 = vsel %vm1469_vm5, %v3286_v30, %v3282_v35 }
 0x53b   : > { %v3020_v29 = vpop.permute.xlu0 %3019  ;;  %v3026_v59 = vpop.permute.xlu1 %3025 }
 0x53c   : > { %v3300_v53 = vrot.slane %v3020_v29, %v4607_v19  ;;  %v3310_v8 = vrot.slane %v3026_v59, %v4601_v7  ;;  %v3372_v29 = vsel %vm1758_vm7, %v3268_v20, %v3371_v61 }
 0x53e   : > { %v3301_v63 = vsel %vm1462_vm4, %v3300_v53, %v3296_v57 }
 0x53f   : > { %v3029_v51 = vpop.permute.xlu0 %3028  ;;  %v3023_v6 = vpop.permute.xlu1 %3022 }
 0x540   : > { %v3314_v36 = vrot.slane %v3029_v51, %v4604_v46  ;;  %v3305_v42 = vrot.slane %v3023_v6, %v4610_v52 }
 0x542   : > { %v3315_v4 = vsel %vm1455_vm3, %v3314_v36, %v3310_v8  ;;  %v3306_v16 = vsel %vm1469_vm5, %v3305_v42, %v3301_v63 }
 0x543   : > { %v3032_v15 = vpop.permute.xlu0 %3031  ;;  %v3038_v26 = vpop.permute.xlu1 %3037 }
 0x544   : > { %v3319_v49 = vrot.slane %v3032_v15, %v4607_v19  ;;  %v3329_v55 = vrot.slane %v3038_v26, %v4601_v7  ;;  %v3373_v26 = vsel %vm1760_vm8, %v3287_v0, %v3372_v29 }
 0x546   : > { %v3320_v21 = vsel %vm1462_vm4, %v3319_v49, %v3315_v4 }
 0x547   : > { %v3041_v37 = vpop.permute.xlu0 %3040  ;;  %v3035_v25 = vpop.permute.xlu1 %3034 }
 0x548   : > { %v3333_v17 = vrot.slane %v3041_v37, %v4604_v46  ;;  %v3324_v56 = vrot.slane %v3035_v25, %v4610_v52 }
 0x54a   : > { %v3334_v23 = vsel %vm1455_vm3, %v3333_v17, %v3329_v55  ;;  %v3325_v59 = vsel %vm1469_vm5, %v3324_v56, %v3320_v21 }
 0x54b   : > { %v3044_v5 = vpop.permute.xlu0 %3043  ;;  %v3050_v60 = vpop.permute.xlu1 %3049 }
 0x54c   : > { %v3338_v11 = vrot.slane %v3044_v5, %v4607_v19  ;;  %v3348_v6 = vrot.slane %v3050_v60, %v4601_v7  ;;  %v3374_v7 = vsel %vm1762_vm9, %v3306_v16, %v3373_v26 }
 0x54d   : > { %v3375_v40 = vsel %vm1764_vm10, %v3325_v59, %v3374_v7 }
 0x54e   : > { %v3339_v51 = vsel %vm1462_vm4, %v3338_v11, %v3334_v23 }
 0x54f   : > { %v3053_v13 = vpop.permute.xlu0 %3052  ;;  %v3047_v43 = vpop.permute.xlu1 %3046 }
 0x550   : > { %v3343_v32 = vrot.slane %v3047_v43, %v4610_v52  ;;  %v3352_v62 = vrot.slane %v3053_v13, %v4604_v46 }
 0x552   : > { %v3344_v54 = vsel %vm1469_vm5, %v3343_v32, %v3339_v51  ;;  %v3353_v45 = vsel %vm1455_vm3, %v3352_v62, %v3348_v6 }
 0x553   : > { %v3056_v15 = vpop.permute.xlu0 %3055  ;;  %v3059_v46 = vpop.permute.xlu1 %3058 }
 0x554   : > { %v3357_v14 = vrot.slane %v3056_v15, %v4607_v19  ;;  %v3362_v12 = vrot.slane %v3059_v46, %v4610_v52  ;;  %v3376_v19 = vsel %vm1766_vm11, %v3344_v54, %v3375_v40 }
 0x556   : > { %v3358_v38 = vsel %vm1462_vm4, %v3357_v14, %v3353_v45 }
 0x557   : > { %v3363_v52 = vsel %vm1469_vm5, %v3362_v12, %v3358_v38 }
 0x558   : > { %v3377_v9 = vsel %vm1768_vm12, %v3363_v52, %v3376_v19 }
 0x559   : > { %3381 = vst.msk [vmem:[%s5779_s12 + $0x8] sm:$0xff] %vm1779_vm13, %v3377_v9 }
 0x55a   : > { %3833 = shalt.err (!%p3830_p5)
}
 0x55b   : > { %s3834_s19 = scalar_lea.hbm %s5851_s15, 256  ;;  %s3838_s30 = scalar_lea.hbm %s5907_s6, 1024 }
 0x55c   : > { %p3835_p7 = scmp.ne.s32.totalorder %s5851_s15, %s3834_s19  ;;  %p3839_p11 = scmp.lt.u32.totalorder %s5851_s15, %s5907_s6 }
 0x55d   : > { %p3840_p12 = scmp.lt.u32.totalorder %s3838_s30, %s3834_s19  ;;  %p3842_p0 = scmp.lt.u32.totalorder %s3834_s19, %s5851_s15 }
 0x55e   : > { %p3836_p9 = pnand %p3835_p7, %p3967_p6 }
 0x55f   : > { %p3841_p13 = por %p3840_p12, %p3839_p11 }
 0x560   : > { %p3837_p10 = pneg %p3836_p9 }
 0x561   : > { %p3843_p1 = por %p3842_p0, %p3841_p13 }
 0x563   : > { %p3844_p2 = pnand %p3843_p1, %p3837_p10 }
 0x565   : > { %3847 = shalt.err (!%p3844_p2)
}
 0x566   : > { %s3888_s12 = smov 128   ;;  %s3889_s13 = smov 512  }
 0x567   : > { %s3890_s5 = smov 8  }
 0x568   : > { %3611 = dma.vmem_to_hbm [thread:$0]  (%p3967_p6), %s5842_s20, 256, %s5851_s15, %s5860_s16, %s3888_s12, %s3889_s13, %s3890_s5  }
 0x569 PF: > { %p3617_p3 = scmp.ge.s32.totalorder %s3882_s26, 2  ;;  %s3410_s14 = sand.u32 1, %s3870_s23  }
 0x56a   : > { %s3411_s17 = scalar_lea.sflag [#allocation5], %s3410_s14 }
 0x56b   : > { %p3614_p4 = pnand %p3617_p3, %p3971_p8 }
 0x56d   : > { %3865 = dma.done.wait (!%p3614_p4), %s3411_s17, 256  }
 0x56e   : > { %3867 = vsyncadd (!%p3614_p4), %s3411_s17, 4294967040  ;;  %p18_p5 = scmp.ge.s32.totalorder %s3952_s28, 6   ;;  %s6180_s23 = smov %s3874_s24 }
 0x56f   : > { %s6181_s24 = smov %s3878_s25  ;;  %s6182_s25 = smov %s3965_s7 }
 0x570   : > { %s6183_s26 = smov %s3952_s28  ;;  %20 = sbr.rel (!%p18_p5) target bundleno = 6 (0x6), region = 122 }
 0x577   :  { %3416 = vsyncpa [#allocation5], 1 }
 0x578   :  { %3418 = vsyncpa [#allocation5 + $0x1], 1 }

</bundles_post_ra>
